<compile_context>
chip_gen: v6e
topology: v6e:2x2x1
jax: 0.10.0
libtpu: 0.0.40
codegen_flags: <defaults>
</compile_context>

<pallas_src>
import functools

import jax
import jax.numpy as jnp
from jax.experimental import pallas as pl
from jax.experimental.pallas import tpu as pltpu

_BN_EPS = 1e-5


def _round_up(a, m):
    return -(-a // m) * m


def _pick_l_tile(l_pad):
    """Largest multiple-of-128 tile <= 4096 dividing the padded length (big per-step work)."""
    for t in range(4096, 0, -128):
        if l_pad % t == 0:
            return t
    return 128          # unreachable: l_pad is a multiple of 128


def _pick_chunk(l_tile):
    """In-kernel lane-chunk width: keeps the live f32 accumulator <= (Cout, 512)."""
    for c in (512, 384, 256, 128):
        if l_tile % c == 0:
            return c
    return l_tile       # unreachable: l_tile is a multiple of 128


def _conv_chunk(x_ref, w_ref, lane0, chunk, n_taps):
    """One (Cout, chunk) f32 conv chunk: K accumulated MXU matmuls over static lane windows."""
    acc = None
    for k in range(n_taps):
        xw = x_ref[0, 0, :, lane0 + k:lane0 + k + chunk]            # (Cin, chunk) bf16, static
        part = jnp.dot(w_ref[k], xw, preferred_element_type=jnp.float32)
        acc = part if acc is None else acc + part
    return acc


def _stats_kernel(x_ref, w_ref, s_ref, *, l_tile, chunk, n_chunks, n_taps, seq_len, apply_mask):
    """Pass 1: per-(batch, l-tile) partial BN statistics (sum, sum-of-squares) over real columns."""
    cout = s_ref.shape[2]
    tile_base = pl.program_id(1) * l_tile
    s_acc = jnp.zeros((cout, 1), jnp.float32)
    q_acc = jnp.zeros((cout, 1), jnp.float32)
    for c in range(n_chunks):                                       # static unroll
        conv = _conv_chunk(x_ref, w_ref, c * chunk, chunk, n_taps)  # (Cout, chunk) f32
        if apply_mask:                                              # exclude L-padding columns
            col = tile_base + c * chunk + jax.lax.broadcasted_iota(jnp.int32, conv.shape, 1)
            conv = jnp.where(col < seq_len, conv, 0.0)
        s_acc = s_acc + jnp.sum(conv, axis=1, keepdims=True)
        q_acc = q_acc + jnp.sum(conv * conv, axis=1, keepdims=True)
    s_ref[0, 0] = jnp.concatenate([s_acc, q_acc], axis=1)           # (Cout, 2)


def _apply_kernel(x_ref, w_ref, scale_ref, shift_ref, o_ref, *, chunk, n_chunks, n_taps):
    """Pass 2: recompute the conv chunk, apply the per-channel BN affine + ReLU, lane-dense store."""
    scale = scale_ref[...]                                          # (Cout, 1) f32
    shift = shift_ref[...]
    for c in range(n_chunks):                                       # static unroll
        conv = _conv_chunk(x_ref, w_ref, c * chunk, chunk, n_taps)  # (Cout, chunk) f32
        y = jnp.maximum(conv * scale + shift, 0.0)
        o_ref[0, :, c * chunk:(c + 1) * chunk] = y.astype(o_ref.dtype)


@functools.partial(jax.jit, static_argnames=("out_dtype",))
def dilated_stride_embed(x, w, b, gamma, beta, *, out_dtype=jnp.float32):
    """x: (B, L, C_in) f32; w: (C_out, C_in, K) torch Conv1d weight layout.
    Returns (B, C_out, L) in out_dtype, matching the PyTorch module's forward."""
    B, L, Cin = x.shape
    Cout, Cin_w, K = w.shape
    assert Cin == Cin_w and K % 2 == 1
    P = (K - 1) // 2
    del b                      # conv bias is exactly cancelled by BatchNorm's mean subtraction

    L_pad = _round_up(L, 128)
    l_tile = _pick_l_tile(L_pad)
    chunk = _pick_chunk(l_tile)
    n_l = L_pad // l_tile
    n_chunks = l_tile // chunk
    W = l_tile + 2 * P         # per-tile input width (includes the K-1 halo)

    # Input prep (single small stream, Cin=12): transpose + cast + pad to (B, Cin, L_pad + 2P)
    # bf16 with L on the lane axis, then cut overlapping halo tiles so every in-kernel lane
    # offset is static.  For n_l == 1 (small/medium L) this is just a reshape.
    xp = jnp.pad(jnp.transpose(x, (0, 2, 1)).astype(jnp.bfloat16),
                 ((0, 0), (0, 0), (P, P + (L_pad - L))))            # (B, Cin, L_pad + 2P)
    if n_l == 1:
        xt = xp[:, None, :, :]                                      # (B, 1, Cin, W)
    else:
        xt = jnp.stack([xp[:, :, li * l_tile:li * l_tile + W] for li in range(n_l)], axis=1)

    # Per-tap weights (K, Cout, Cin) bf16, indexed with static k inside the kernel (no shuffles).
    wt = jnp.transpose(w, (2, 0, 1)).astype(jnp.bfloat16)

    x_spec = pl.BlockSpec((1, 1, Cin, W), lambda bi, li: (bi, li, 0, 0))
    w_spec = pl.BlockSpec((K, Cout, Cin), lambda bi, li: (0, 0, 0))
    vec_spec = pl.BlockSpec((Cout, 1), lambda bi, li: (0, 0))

    # VMEM budget from the actual (double-buffered) block footprints, with headroom.
    out_isz = jnp.dtype(out_dtype).itemsize
    x_blk = 2 * _round_up(Cin, 16) * _round_up(W, 128) * 2
    w_blk = 2 * K * _round_up(Cout, 16) * _round_up(Cin, 128) * 2
    o_blk = 2 * _round_up(Cout, 8) * l_tile * max(out_isz, 4)
    vmem_limit = int(min(max(2 * (x_blk + w_blk + o_blk) + (8 << 20), 32 << 20), 96 << 20))

    flops = 2 * B * L_pad * K * Cin * Cout

    # ---- pass 1: per-(b, l-tile) partial sum / sum-of-squares of the conv output ----
    stats = pl.pallas_call(
        functools.partial(_stats_kernel, l_tile=l_tile, chunk=chunk, n_chunks=n_chunks,
                          n_taps=K, seq_len=L, apply_mask=(L_pad != L)),
        out_shape=jax.ShapeDtypeStruct((B, n_l, Cout, 2), jnp.float32),
        grid=(B, n_l),
        in_specs=[x_spec, w_spec],
        out_specs=pl.BlockSpec((1, 1, Cout, 2), lambda bi, li: (bi, li, 0, 0)),
        compiler_params=pltpu.CompilerParams(
            dimension_semantics=("parallel", "parallel"),    # per-(b, li) stats blocks
            vmem_limit_bytes=vmem_limit),
        cost_estimate=pl.CostEstimate(
            flops=flops, transcendentals=0,
            bytes_accessed=xt.size * 2 + wt.size * 2 + B * n_l * Cout * 2 * 4),
    )(xt, wt)

    # ---- tiny JAX epilogue: Chan / parallel-variance merge of the partial groups ----
    sum_g = stats[..., 0]                                           # (B, n_l, Cout)
    sq_g = stats[..., 1]
    cnt = jnp.clip(L - jnp.arange(n_l) * l_tile, 1, l_tile).astype(jnp.float32)[None, :, None]
    m_g = sum_g / cnt
    m2_g = jnp.maximum(sq_g - cnt * m_g * m_g, 0.0)                 # group-centered 2nd moment
    n_total = float(B * L)
    mean = jnp.sum(sum_g, axis=(0, 1)) / n_total                    # (Cout,)
    m2 = jnp.sum(m2_g, axis=(0, 1)) + jnp.sum(cnt * (m_g - mean) ** 2, axis=(0, 1))
    var = m2 / n_total                                              # biased batch variance (BN)
    inv_std = jax.lax.rsqrt(var + _BN_EPS)
    g32 = gamma.astype(jnp.float32)
    scale = (g32 * inv_std).reshape(Cout, 1)
    shift = (beta.astype(jnp.float32) - mean * g32 * inv_std).reshape(Cout, 1)

    # ---- pass 2: recompute conv, BN affine + ReLU, lane-dense (B, Cout, L_pad) store ----
    out = pl.pallas_call(
        functools.partial(_apply_kernel, chunk=chunk, n_chunks=n_chunks, n_taps=K),
        out_shape=jax.ShapeDtypeStruct((B, Cout, L_pad), out_dtype),
        grid=(B, n_l),
        in_specs=[x_spec, w_spec, vec_spec, vec_spec],
        out_specs=pl.BlockSpec((1, Cout, l_tile), lambda bi, li: (bi, 0, li)),
        compiler_params=pltpu.CompilerParams(
            dimension_semantics=("parallel", "parallel"),
            vmem_limit_bytes=vmem_limit),
        cost_estimate=pl.CostEstimate(
            flops=flops, transcendentals=0,
            bytes_accessed=xt.size * 2 + wt.size * 2 + B * Cout * L_pad * out_isz),
    )(xt, wt, scale, shift)

    return out if L_pad == L else out[:, :, :L]


if __name__ == "__main__":
    orig_dim, embed_dim, K = 12, 32, 11

    key = jax.random.PRNGKey(0)
    kw, kb, kx1, kx2 = jax.random.split(key, 4)

    # Deterministic synthetic parameters (shapes per nn.Conv1d / nn.BatchNorm1d defaults).
    fan_in = orig_dim * K
    bound = 1.0 / (fan_in ** 0.5)
    w = jax.random.uniform(kw, (embed_dim, orig_dim, K), jnp.float32, -bound, bound)
    b = jax.random.uniform(kb, (embed_dim,), jnp.float32, -bound, bound)
    gamma = jnp.ones((embed_dim,), jnp.float32)       # BatchNorm default affine init
    beta = jnp.zeros((embed_dim,), jnp.float32)

    def reference(x):
        # Pure-JAX reference using the same bf16 matmul operands (conv bias omitted in both:
        # BatchNorm's mean subtraction cancels it exactly).
        _, L, _ = x.shape
        P = (K - 1) // 2
        xpad = jnp.pad(x, ((0, 0), (P, P), (0, 0))).astype(jnp.bfloat16)
        win = jnp.stack([xpad[:, k:k + L, :] for k in range(K)], axis=2)     # (B, L, K, Cin)
        conv = jnp.einsum("blkc,ock->bol", win, w.astype(jnp.bfloat16),
                          preferred_element_type=jnp.float32)                # (B, Cout, L)
        mean = jnp.mean(conv, axis=(0, 2), keepdims=True)
        var = jnp.mean((conv - mean) ** 2, axis=(0, 2), keepdims=True)       # biased batch var
        return jnp.maximum((conv - mean) * jax.lax.rsqrt(var + _BN_EPS)
                           * gamma[None, :, None] + beta[None, :, None], 0.0)

    # Module input is (B, L, orig_dim); the module permutes to (B, orig_dim, L) internally.
    # Second case exercises L-padding/masking and the multi-chunk in-kernel loop.
    for kx, (B, L) in ((kx1, (2, 16)), (kx2, (2, 1100))):
        x = jax.random.normal(kx, (B, L, orig_dim), jnp.float32)
        y = jax.block_until_ready(dilated_stride_embed(x, w, b, gamma, beta))
        assert y.shape == (B, embed_dim, L), y.shape
        ref = reference(x)
        err = float(jnp.max(jnp.abs(y - ref)))
        assert jnp.allclose(y, ref, atol=2e-2, rtol=2e-2), err

    print("KERNEL_OK")
</pallas_src>

<mosaic_0001>
module attributes {stable_mosaic.version = 11 : i64} {
  func.func @_stats_kernel(%arg0: i32, %arg1: i32, %arg2: memref<1x1x12x138xbf16, #tpu.memory_space<vmem>>, %arg3: memref<11x32x12xbf16, #tpu.memory_space<vmem>>, %arg4: memref<1x1x32x2xf32, #tpu.memory_space<vmem>>) attributes {dimension_semantics = [#tpu.dimension_semantics<parallel>, #tpu.dimension_semantics<parallel>], iteration_bounds = array<i64: 2, 1>, scalar_prefetch = 0 : i64, scratch_operands = 0 : i64, tpu.core_type = #tpu.core_type<tc>, window_params = [{transform_indices = @transform_0, window_bounds = array<i64: 1, 1, 12, 138>}, {pipeline_mode = #tpu.pipeline_mode<synchronous>, transform_indices = @transform_1, window_bounds = array<i64: 11, 32, 12>}, {transform_indices = @transform_2, window_bounds = array<i64: 1, 1, 32, 2>}]} {
    %c128_i32 = arith.constant 128 : i32
    %0 = arith.muli %arg1, %c128_i32 : i32
    %cst = arith.constant 0.000000e+00 : f32
    %1 = vector.broadcast %cst : f32 to vector<32x1xf32>
    %cst_0 = arith.constant 0.000000e+00 : f32
    %2 = vector.broadcast %cst_0 : f32 to vector<32x1xf32>
    %c0 = arith.constant 0 : index
    %c0_1 = arith.constant 0 : index
    %c0_2 = arith.constant 0 : index
    %c0_3 = arith.constant 0 : index
    %3 = vector.load %arg2[%c0, %c0_1, %c0_2, %c0_3] : memref<1x1x12x138xbf16, #tpu.memory_space<vmem>>, vector<1x1x12x128xbf16>
    %4 = vector.shape_cast %3 : vector<1x1x12x128xbf16> to vector<12x128xbf16>
    %c0_4 = arith.constant 0 : index
    %c0_5 = arith.constant 0 : index
    %c0_6 = arith.constant 0 : index
    %5 = vector.load %arg3[%c0_4, %c0_5, %c0_6] : memref<11x32x12xbf16, #tpu.memory_space<vmem>>, vector<1x32x12xbf16>
    %6 = vector.shape_cast %5 : vector<1x32x12xbf16> to vector<32x12xbf16>
    %cst_7 = arith.constant dense<0.000000e+00> : vector<32x128xf32>
    %7 = tpu.matmul %6, %4, %cst_7 {dimension_numbers = #tpu.dot_dimension_numbers<[1], [0], [0], [1], [0, 0, 1, 1], [], []>} : vector<32x12xbf16>, vector<12x128xbf16>, vector<32x128xf32> -> vector<32x128xf32>
    %c0_8 = arith.constant 0 : index
    %c0_9 = arith.constant 0 : index
    %c0_10 = arith.constant 0 : index
    %c1 = arith.constant 1 : index
    %8 = vector.load %arg2[%c0_8, %c0_9, %c0_10, %c1] : memref<1x1x12x138xbf16, #tpu.memory_space<vmem>>, vector<1x1x12x128xbf16>
    %9 = vector.shape_cast %8 : vector<1x1x12x128xbf16> to vector<12x128xbf16>
    %c1_11 = arith.constant 1 : index
    %c0_12 = arith.constant 0 : index
    %c0_13 = arith.constant 0 : index
    %10 = vector.load %arg3[%c1_11, %c0_12, %c0_13] : memref<11x32x12xbf16, #tpu.memory_space<vmem>>, vector<1x32x12xbf16>
    %11 = vector.shape_cast %10 : vector<1x32x12xbf16> to vector<32x12xbf16>
    %cst_14 = arith.constant dense<0.000000e+00> : vector<32x128xf32>
    %12 = tpu.matmul %11, %9, %cst_14 {dimension_numbers = #tpu.dot_dimension_numbers<[1], [0], [0], [1], [0, 0, 1, 1], [], []>} : vector<32x12xbf16>, vector<12x128xbf16>, vector<32x128xf32> -> vector<32x128xf32>
    %13 = arith.addf %7, %12 : vector<32x128xf32>
    %c0_15 = arith.constant 0 : index
    %c0_16 = arith.constant 0 : index
    %c0_17 = arith.constant 0 : index
    %c2 = arith.constant 2 : index
    %14 = vector.load %arg2[%c0_15, %c0_16, %c0_17, %c2] : memref<1x1x12x138xbf16, #tpu.memory_space<vmem>>, vector<1x1x12x128xbf16>
    %15 = vector.shape_cast %14 : vector<1x1x12x128xbf16> to vector<12x128xbf16>
    %c2_18 = arith.constant 2 : index
    %c0_19 = arith.constant 0 : index
    %c0_20 = arith.constant 0 : index
    %16 = vector.load %arg3[%c2_18, %c0_19, %c0_20] : memref<11x32x12xbf16, #tpu.memory_space<vmem>>, vector<1x32x12xbf16>
    %17 = vector.shape_cast %16 : vector<1x32x12xbf16> to vector<32x12xbf16>
    %cst_21 = arith.constant dense<0.000000e+00> : vector<32x128xf32>
    %18 = tpu.matmul %17, %15, %cst_21 {dimension_numbers = #tpu.dot_dimension_numbers<[1], [0], [0], [1], [0, 0, 1, 1], [], []>} : vector<32x12xbf16>, vector<12x128xbf16>, vector<32x128xf32> -> vector<32x128xf32>
    %19 = arith.addf %13, %18 : vector<32x128xf32>
    %c0_22 = arith.constant 0 : index
    %c0_23 = arith.constant 0 : index
    %c0_24 = arith.constant 0 : index
    %c3 = arith.constant 3 : index
    %20 = vector.load %arg2[%c0_22, %c0_23, %c0_24, %c3] : memref<1x1x12x138xbf16, #tpu.memory_space<vmem>>, vector<1x1x12x128xbf16>
    %21 = vector.shape_cast %20 : vector<1x1x12x128xbf16> to vector<12x128xbf16>
    %c3_25 = arith.constant 3 : index
    %c0_26 = arith.constant 0 : index
    %c0_27 = arith.constant 0 : index
    %22 = vector.load %arg3[%c3_25, %c0_26, %c0_27] : memref<11x32x12xbf16, #tpu.memory_space<vmem>>, vector<1x32x12xbf16>
    %23 = vector.shape_cast %22 : vector<1x32x12xbf16> to vector<32x12xbf16>
    %cst_28 = arith.constant dense<0.000000e+00> : vector<32x128xf32>
    %24 = tpu.matmul %23, %21, %cst_28 {dimension_numbers = #tpu.dot_dimension_numbers<[1], [0], [0], [1], [0, 0, 1, 1], [], []>} : vector<32x12xbf16>, vector<12x128xbf16>, vector<32x128xf32> -> vector<32x128xf32>
    %25 = arith.addf %19, %24 : vector<32x128xf32>
    %c0_29 = arith.constant 0 : index
    %c0_30 = arith.constant 0 : index
    %c0_31 = arith.constant 0 : index
    %c4 = arith.constant 4 : index
    %26 = vector.load %arg2[%c0_29, %c0_30, %c0_31, %c4] : memref<1x1x12x138xbf16, #tpu.memory_space<vmem>>, vector<1x1x12x128xbf16>
    %27 = vector.shape_cast %26 : vector<1x1x12x128xbf16> to vector<12x128xbf16>
    %c4_32 = arith.constant 4 : index
    %c0_33 = arith.constant 0 : index
    %c0_34 = arith.constant 0 : index
    %28 = vector.load %arg3[%c4_32, %c0_33, %c0_34] : memref<11x32x12xbf16, #tpu.memory_space<vmem>>, vector<1x32x12xbf16>
    %29 = vector.shape_cast %28 : vector<1x32x12xbf16> to vector<32x12xbf16>
    %cst_35 = arith.constant dense<0.000000e+00> : vector<32x128xf32>
    %30 = tpu.matmul %29, %27, %cst_35 {dimension_numbers = #tpu.dot_dimension_numbers<[1], [0], [0], [1], [0, 0, 1, 1], [], []>} : vector<32x12xbf16>, vector<12x128xbf16>, vector<32x128xf32> -> vector<32x128xf32>
    %31 = arith.addf %25, %30 : vector<32x128xf32>
    %c0_36 = arith.constant 0 : index
    %c0_37 = arith.constant 0 : index
    %c0_38 = arith.constant 0 : index
    %c5 = arith.constant 5 : index
    %32 = vector.load %arg2[%c0_36, %c0_37, %c0_38, %c5] : memref<1x1x12x138xbf16, #tpu.memory_space<vmem>>, vector<1x1x12x128xbf16>
    %33 = vector.shape_cast %32 : vector<1x1x12x128xbf16> to vector<12x128xbf16>
    %c5_39 = arith.constant 5 : index
    %c0_40 = arith.constant 0 : index
    %c0_41 = arith.constant 0 : index
    %34 = vector.load %arg3[%c5_39, %c0_40, %c0_41] : memref<11x32x12xbf16, #tpu.memory_space<vmem>>, vector<1x32x12xbf16>
    %35 = vector.shape_cast %34 : vector<1x32x12xbf16> to vector<32x12xbf16>
    %cst_42 = arith.constant dense<0.000000e+00> : vector<32x128xf32>
    %36 = tpu.matmul %35, %33, %cst_42 {dimension_numbers = #tpu.dot_dimension_numbers<[1], [0], [0], [1], [0, 0, 1, 1], [], []>} : vector<32x12xbf16>, vector<12x128xbf16>, vector<32x128xf32> -> vector<32x128xf32>
    %37 = arith.addf %31, %36 : vector<32x128xf32>
    %c0_43 = arith.constant 0 : index
    %c0_44 = arith.constant 0 : index
    %c0_45 = arith.constant 0 : index
    %c6 = arith.constant 6 : index
    %38 = vector.load %arg2[%c0_43, %c0_44, %c0_45, %c6] : memref<1x1x12x138xbf16, #tpu.memory_space<vmem>>, vector<1x1x12x128xbf16>
    %39 = vector.shape_cast %38 : vector<1x1x12x128xbf16> to vector<12x128xbf16>
    %c6_46 = arith.constant 6 : index
    %c0_47 = arith.constant 0 : index
    %c0_48 = arith.constant 0 : index
    %40 = vector.load %arg3[%c6_46, %c0_47, %c0_48] : memref<11x32x12xbf16, #tpu.memory_space<vmem>>, vector<1x32x12xbf16>
    %41 = vector.shape_cast %40 : vector<1x32x12xbf16> to vector<32x12xbf16>
    %cst_49 = arith.constant dense<0.000000e+00> : vector<32x128xf32>
    %42 = tpu.matmul %41, %39, %cst_49 {dimension_numbers = #tpu.dot_dimension_numbers<[1], [0], [0], [1], [0, 0, 1, 1], [], []>} : vector<32x12xbf16>, vector<12x128xbf16>, vector<32x128xf32> -> vector<32x128xf32>
    %43 = arith.addf %37, %42 : vector<32x128xf32>
    %c0_50 = arith.constant 0 : index
    %c0_51 = arith.constant 0 : index
    %c0_52 = arith.constant 0 : index
    %c7 = arith.constant 7 : index
    %44 = vector.load %arg2[%c0_50, %c0_51, %c0_52, %c7] : memref<1x1x12x138xbf16, #tpu.memory_space<vmem>>, vector<1x1x12x128xbf16>
    %45 = vector.shape_cast %44 : vector<1x1x12x128xbf16> to vector<12x128xbf16>
    %c7_53 = arith.constant 7 : index
    %c0_54 = arith.constant 0 : index
    %c0_55 = arith.constant 0 : index
    %46 = vector.load %arg3[%c7_53, %c0_54, %c0_55] : memref<11x32x12xbf16, #tpu.memory_space<vmem>>, vector<1x32x12xbf16>
    %47 = vector.shape_cast %46 : vector<1x32x12xbf16> to vector<32x12xbf16>
    %cst_56 = arith.constant dense<0.000000e+00> : vector<32x128xf32>
    %48 = tpu.matmul %47, %45, %cst_56 {dimension_numbers = #tpu.dot_dimension_numbers<[1], [0], [0], [1], [0, 0, 1, 1], [], []>} : vector<32x12xbf16>, vector<12x128xbf16>, vector<32x128xf32> -> vector<32x128xf32>
    %49 = arith.addf %43, %48 : vector<32x128xf32>
    %c0_57 = arith.constant 0 : index
    %c0_58 = arith.constant 0 : index
    %c0_59 = arith.constant 0 : index
    %c8 = arith.constant 8 : index
    %50 = vector.load %arg2[%c0_57, %c0_58, %c0_59, %c8] : memref<1x1x12x138xbf16, #tpu.memory_space<vmem>>, vector<1x1x12x128xbf16>
    %51 = vector.shape_cast %50 : vector<1x1x12x128xbf16> to vector<12x128xbf16>
    %c8_60 = arith.constant 8 : index
    %c0_61 = arith.constant 0 : index
    %c0_62 = arith.constant 0 : index
    %52 = vector.load %arg3[%c8_60, %c0_61, %c0_62] : memref<11x32x12xbf16, #tpu.memory_space<vmem>>, vector<1x32x12xbf16>
    %53 = vector.shape_cast %52 : vector<1x32x12xbf16> to vector<32x12xbf16>
    %cst_63 = arith.constant dense<0.000000e+00> : vector<32x128xf32>
    %54 = tpu.matmul %53, %51, %cst_63 {dimension_numbers = #tpu.dot_dimension_numbers<[1], [0], [0], [1], [0, 0, 1, 1], [], []>} : vector<32x12xbf16>, vector<12x128xbf16>, vector<32x128xf32> -> vector<32x128xf32>
    %55 = arith.addf %49, %54 : vector<32x128xf32>
    %c0_64 = arith.constant 0 : index
    %c0_65 = arith.constant 0 : index
    %c0_66 = arith.constant 0 : index
    %c9 = arith.constant 9 : index
    %56 = vector.load %arg2[%c0_64, %c0_65, %c0_66, %c9] : memref<1x1x12x138xbf16, #tpu.memory_space<vmem>>, vector<1x1x12x128xbf16>
    %57 = vector.shape_cast %56 : vector<1x1x12x128xbf16> to vector<12x128xbf16>
    %c9_67 = arith.constant 9 : index
    %c0_68 = arith.constant 0 : index
    %c0_69 = arith.constant 0 : index
    %58 = vector.load %arg3[%c9_67, %c0_68, %c0_69] : memref<11x32x12xbf16, #tpu.memory_space<vmem>>, vector<1x32x12xbf16>
    %59 = vector.shape_cast %58 : vector<1x32x12xbf16> to vector<32x12xbf16>
    %cst_70 = arith.constant dense<0.000000e+00> : vector<32x128xf32>
    %60 = tpu.matmul %59, %57, %cst_70 {dimension_numbers = #tpu.dot_dimension_numbers<[1], [0], [0], [1], [0, 0, 1, 1], [], []>} : vector<32x12xbf16>, vector<12x128xbf16>, vector<32x128xf32> -> vector<32x128xf32>
    %61 = arith.addf %55, %60 : vector<32x128xf32>
    %c0_71 = arith.constant 0 : index
    %c0_72 = arith.constant 0 : index
    %c0_73 = arith.constant 0 : index
    %c10 = arith.constant 10 : index
    %62 = vector.load %arg2[%c0_71, %c0_72, %c0_73, %c10] : memref<1x1x12x138xbf16, #tpu.memory_space<vmem>>, vector<1x1x12x128xbf16>
    %63 = vector.shape_cast %62 : vector<1x1x12x128xbf16> to vector<12x128xbf16>
    %c10_74 = arith.constant 10 : index
    %c0_75 = arith.constant 0 : index
    %c0_76 = arith.constant 0 : index
    %64 = vector.load %arg3[%c10_74, %c0_75, %c0_76] : memref<11x32x12xbf16, #tpu.memory_space<vmem>>, vector<1x32x12xbf16>
    %65 = vector.shape_cast %64 : vector<1x32x12xbf16> to vector<32x12xbf16>
    %cst_77 = arith.constant dense<0.000000e+00> : vector<32x128xf32>
    %66 = tpu.matmul %65, %63, %cst_77 {dimension_numbers = #tpu.dot_dimension_numbers<[1], [0], [0], [1], [0, 0, 1, 1], [], []>} : vector<32x12xbf16>, vector<12x128xbf16>, vector<32x128xf32> -> vector<32x128xf32>
    %67 = arith.addf %61, %66 : vector<32x128xf32>
    %c0_i32 = arith.constant 0 : i32
    %68 = arith.addi %0, %c0_i32 : i32
    %69 = tpu.iota {dimensions = array<i32: 1>} : vector<32x128xi32>
    %70 = vector.broadcast %68 : i32 to vector<32x128xi32>
    %71 = arith.addi %70, %69 : vector<32x128xi32>
    %c16_i32 = arith.constant 16 : i32
    %72 = vector.broadcast %c16_i32 : i32 to vector<32x128xi32>
    %73 = arith.cmpi slt, %71, %72 : vector<32x128xi32>
    %cst_78 = arith.constant 0.000000e+00 : f32
    %74 = vector.broadcast %cst_78 : f32 to vector<32x128xf32>
    %75 = arith.select %73, %67, %74 : vector<32x128xi1>, vector<32x128xf32>
    %cst_79 = arith.constant dense<0.000000e+00> : vector<32xf32>
    %76 = vector.multi_reduction <add>, %75, %cst_79 [1] : vector<32x128xf32> to vector<32xf32>
    %77 = vector.shape_cast %76 : vector<32xf32> to vector<32x1xf32>
    %78 = arith.addf %1, %77 : vector<32x1xf32>
    %79 = arith.mulf %75, %75 : vector<32x128xf32>
    %cst_80 = arith.constant dense<0.000000e+00> : vector<32xf32>
    %80 = vector.multi_reduction <add>, %79, %cst_80 [1] : vector<32x128xf32> to vector<32xf32>
    %81 = vector.shape_cast %80 : vector<32xf32> to vector<32x1xf32>
    %82 = arith.addf %2, %81 : vector<32x1xf32>
    %83 = tpu.concatenate %78, %82 in 1 : vector<32x1xf32>, vector<32x1xf32> -> vector<32x2xf32>
    %c0_81 = arith.constant 0 : index
    %c0_82 = arith.constant 0 : index
    %c0_83 = arith.constant 0 : index
    %c0_84 = arith.constant 0 : index
    %84 = vector.load %arg4[%c0_81, %c0_82, %c0_83, %c0_84] : memref<1x1x32x2xf32, #tpu.memory_space<vmem>>, vector<1x1x32x2xf32>
    %85 = vector.shape_cast %84 : vector<1x1x32x2xf32> to vector<32x2xf32>
    %86 = vector.shape_cast %83 : vector<32x2xf32> to vector<1x1x32x2xf32>
    tpu.vector_store %arg4[%c0_81, %c0_82, %c0_83, %c0_84], %86 {strides = array<i32>} : memref<1x1x32x2xf32, #tpu.memory_space<vmem>>, vector<1x1x32x2xf32>,
    return
  }
  func.func @transform_0(%arg0: i32, %arg1: i32) -> (i32, i32, i32, i32) {
    %c0_i32 = arith.constant 0 : i32
    %c0_i32_0 = arith.constant 0 : i32
    %c0_i32_1 = arith.constant 0 : i32
    return %arg0, %arg1, %c0_i32, %c0_i32_0 : i32, i32, i32, i32
  }
  func.func @transform_1(%arg0: i32, %arg1: i32) -> (i32, i32, i32) {
    %c0_i32 = arith.constant 0 : i32
    %c0_i32_0 = arith.constant 0 : i32
    %c0_i32_1 = arith.constant 0 : i32
    %c0_i32_2 = arith.constant 0 : i32
    return %c0_i32, %c0_i32_0, %c0_i32_1 : i32, i32, i32
  }
  func.func @transform_2(%arg0: i32, %arg1: i32) -> (i32, i32, i32, i32) {
    %c0_i32 = arith.constant 0 : i32
    %c0_i32_0 = arith.constant 0 : i32
    %c0_i32_1 = arith.constant 0 : i32
    return %arg0, %arg1, %c0_i32, %c0_i32_0 : i32, i32, i32, i32
  }
}

module attributes {stable_mosaic.version = 11 : i64} {
  func.func @_apply_kernel(%arg0: i32, %arg1: i32, %arg2: memref<1x1x12x138xbf16, #tpu.memory_space<vmem>>, %arg3: memref<11x32x12xbf16, #tpu.memory_space<vmem>>, %arg4: memref<32x1xf32, #tpu.memory_space<vmem>>, %arg5: memref<32x1xf32, #tpu.memory_space<vmem>>, %arg6: memref<1x32x128xf32, #tpu.memory_space<vmem>>) attributes {dimension_semantics = [#tpu.dimension_semantics<parallel>, #tpu.dimension_semantics<parallel>], iteration_bounds = array<i64: 2, 1>, scalar_prefetch = 0 : i64, scratch_operands = 0 : i64, tpu.core_type = #tpu.core_type<tc>, window_params = [{transform_indices = @transform_0, window_bounds = array<i64: 1, 1, 12, 138>}, {pipeline_mode = #tpu.pipeline_mode<synchronous>, transform_indices = @transform_1, window_bounds = array<i64: 11, 32, 12>}, {pipeline_mode = #tpu.pipeline_mode<synchronous>, transform_indices = @transform_2, window_bounds = array<i64: 32, 1>}, {pipeline_mode = #tpu.pipeline_mode<synchronous>, transform_indices = @transform_3, window_bounds = array<i64: 32, 1>}, {transform_indices = @transform_4, window_bounds = array<i64: 1, 32, 128>}]} {
    %c0 = arith.constant 0 : index
    %c0_0 = arith.constant 0 : index
    %0 = vector.load %arg4[%c0, %c0_0] : memref<32x1xf32, #tpu.memory_space<vmem>>, vector<32x1xf32>
    %c0_1 = arith.constant 0 : index
    %c0_2 = arith.constant 0 : index
    %1 = vector.load %arg5[%c0_1, %c0_2] : memref<32x1xf32, #tpu.memory_space<vmem>>, vector<32x1xf32>
    %c0_3 = arith.constant 0 : index
    %c0_4 = arith.constant 0 : index
    %c0_5 = arith.constant 0 : index
    %c0_6 = arith.constant 0 : index
    %2 = vector.load %arg2[%c0_3, %c0_4, %c0_5, %c0_6] : memref<1x1x12x138xbf16, #tpu.memory_space<vmem>>, vector<1x1x12x128xbf16>
    %3 = vector.shape_cast %2 : vector<1x1x12x128xbf16> to vector<12x128xbf16>
    %c0_7 = arith.constant 0 : index
    %c0_8 = arith.constant 0 : index
    %c0_9 = arith.constant 0 : index
    %4 = vector.load %arg3[%c0_7, %c0_8, %c0_9] : memref<11x32x12xbf16, #tpu.memory_space<vmem>>, vector<1x32x12xbf16>
    %5 = vector.shape_cast %4 : vector<1x32x12xbf16> to vector<32x12xbf16>
    %cst = arith.constant dense<0.000000e+00> : vector<32x128xf32>
    %6 = tpu.matmul %5, %3, %cst {dimension_numbers = #tpu.dot_dimension_numbers<[1], [0], [0], [1], [0, 0, 1, 1], [], []>} : vector<32x12xbf16>, vector<12x128xbf16>, vector<32x128xf32> -> vector<32x128xf32>
    %c0_10 = arith.constant 0 : index
    %c0_11 = arith.constant 0 : index
    %c0_12 = arith.constant 0 : index
    %c1 = arith.constant 1 : index
    %7 = vector.load %arg2[%c0_10, %c0_11, %c0_12, %c1] : memref<1x1x12x138xbf16, #tpu.memory_space<vmem>>, vector<1x1x12x128xbf16>
    %8 = vector.shape_cast %7 : vector<1x1x12x128xbf16> to vector<12x128xbf16>
    %c1_13 = arith.constant 1 : index
    %c0_14 = arith.constant 0 : index
    %c0_15 = arith.constant 0 : index
    %9 = vector.load %arg3[%c1_13, %c0_14, %c0_15] : memref<11x32x12xbf16, #tpu.memory_space<vmem>>, vector<1x32x12xbf16>
    %10 = vector.shape_cast %9 : vector<1x32x12xbf16> to vector<32x12xbf16>
    %cst_16 = arith.constant dense<0.000000e+00> : vector<32x128xf32>
    %11 = tpu.matmul %10, %8, %cst_16 {dimension_numbers = #tpu.dot_dimension_numbers<[1], [0], [0], [1], [0, 0, 1, 1], [], []>} : vector<32x12xbf16>, vector<12x128xbf16>, vector<32x128xf32> -> vector<32x128xf32>
    %12 = arith.addf %6, %11 : vector<32x128xf32>
    %c0_17 = arith.constant 0 : index
    %c0_18 = arith.constant 0 : index
    %c0_19 = arith.constant 0 : index
    %c2 = arith.constant 2 : index
    %13 = vector.load %arg2[%c0_17, %c0_18, %c0_19, %c2] : memref<1x1x12x138xbf16, #tpu.memory_space<vmem>>, vector<1x1x12x128xbf16>
    %14 = vector.shape_cast %13 : vector<1x1x12x128xbf16> to vector<12x128xbf16>
    %c2_20 = arith.constant 2 : index
    %c0_21 = arith.constant 0 : index
    %c0_22 = arith.constant 0 : index
    %15 = vector.load %arg3[%c2_20, %c0_21, %c0_22] : memref<11x32x12xbf16, #tpu.memory_space<vmem>>, vector<1x32x12xbf16>
    %16 = vector.shape_cast %15 : vector<1x32x12xbf16> to vector<32x12xbf16>
    %cst_23 = arith.constant dense<0.000000e+00> : vector<32x128xf32>
    %17 = tpu.matmul %16, %14, %cst_23 {dimension_numbers = #tpu.dot_dimension_numbers<[1], [0], [0], [1], [0, 0, 1, 1], [], []>} : vector<32x12xbf16>, vector<12x128xbf16>, vector<32x128xf32> -> vector<32x128xf32>
    %18 = arith.addf %12, %17 : vector<32x128xf32>
    %c0_24 = arith.constant 0 : index
    %c0_25 = arith.constant 0 : index
    %c0_26 = arith.constant 0 : index
    %c3 = arith.constant 3 : index
    %19 = vector.load %arg2[%c0_24, %c0_25, %c0_26, %c3] : memref<1x1x12x138xbf16, #tpu.memory_space<vmem>>, vector<1x1x12x128xbf16>
    %20 = vector.shape_cast %19 : vector<1x1x12x128xbf16> to vector<12x128xbf16>
    %c3_27 = arith.constant 3 : index
    %c0_28 = arith.constant 0 : index
    %c0_29 = arith.constant 0 : index
    %21 = vector.load %arg3[%c3_27, %c0_28, %c0_29] : memref<11x32x12xbf16, #tpu.memory_space<vmem>>, vector<1x32x12xbf16>
    %22 = vector.shape_cast %21 : vector<1x32x12xbf16> to vector<32x12xbf16>
    %cst_30 = arith.constant dense<0.000000e+00> : vector<32x128xf32>
    %23 = tpu.matmul %22, %20, %cst_30 {dimension_numbers = #tpu.dot_dimension_numbers<[1], [0], [0], [1], [0, 0, 1, 1], [], []>} : vector<32x12xbf16>, vector<12x128xbf16>, vector<32x128xf32> -> vector<32x128xf32>
    %24 = arith.addf %18, %23 : vector<32x128xf32>
    %c0_31 = arith.constant 0 : index
    %c0_32 = arith.constant 0 : index
    %c0_33 = arith.constant 0 : index
    %c4 = arith.constant 4 : index
    %25 = vector.load %arg2[%c0_31, %c0_32, %c0_33, %c4] : memref<1x1x12x138xbf16, #tpu.memory_space<vmem>>, vector<1x1x12x128xbf16>
    %26 = vector.shape_cast %25 : vector<1x1x12x128xbf16> to vector<12x128xbf16>
    %c4_34 = arith.constant 4 : index
    %c0_35 = arith.constant 0 : index
    %c0_36 = arith.constant 0 : index
    %27 = vector.load %arg3[%c4_34, %c0_35, %c0_36] : memref<11x32x12xbf16, #tpu.memory_space<vmem>>, vector<1x32x12xbf16>
    %28 = vector.shape_cast %27 : vector<1x32x12xbf16> to vector<32x12xbf16>
    %cst_37 = arith.constant dense<0.000000e+00> : vector<32x128xf32>
    %29 = tpu.matmul %28, %26, %cst_37 {dimension_numbers = #tpu.dot_dimension_numbers<[1], [0], [0], [1], [0, 0, 1, 1], [], []>} : vector<32x12xbf16>, vector<12x128xbf16>, vector<32x128xf32> -> vector<32x128xf32>
    %30 = arith.addf %24, %29 : vector<32x128xf32>
    %c0_38 = arith.constant 0 : index
    %c0_39 = arith.constant 0 : index
    %c0_40 = arith.constant 0 : index
    %c5 = arith.constant 5 : index
    %31 = vector.load %arg2[%c0_38, %c0_39, %c0_40, %c5] : memref<1x1x12x138xbf16, #tpu.memory_space<vmem>>, vector<1x1x12x128xbf16>
    %32 = vector.shape_cast %31 : vector<1x1x12x128xbf16> to vector<12x128xbf16>
    %c5_41 = arith.constant 5 : index
    %c0_42 = arith.constant 0 : index
    %c0_43 = arith.constant 0 : index
    %33 = vector.load %arg3[%c5_41, %c0_42, %c0_43] : memref<11x32x12xbf16, #tpu.memory_space<vmem>>, vector<1x32x12xbf16>
    %34 = vector.shape_cast %33 : vector<1x32x12xbf16> to vector<32x12xbf16>
    %cst_44 = arith.constant dense<0.000000e+00> : vector<32x128xf32>
    %35 = tpu.matmul %34, %32, %cst_44 {dimension_numbers = #tpu.dot_dimension_numbers<[1], [0], [0], [1], [0, 0, 1, 1], [], []>} : vector<32x12xbf16>, vector<12x128xbf16>, vector<32x128xf32> -> vector<32x128xf32>
    %36 = arith.addf %30, %35 : vector<32x128xf32>
    %c0_45 = arith.constant 0 : index
    %c0_46 = arith.constant 0 : index
    %c0_47 = arith.constant 0 : index
    %c6 = arith.constant 6 : index
    %37 = vector.load %arg2[%c0_45, %c0_46, %c0_47, %c6] : memref<1x1x12x138xbf16, #tpu.memory_space<vmem>>, vector<1x1x12x128xbf16>
    %38 = vector.shape_cast %37 : vector<1x1x12x128xbf16> to vector<12x128xbf16>
    %c6_48 = arith.constant 6 : index
    %c0_49 = arith.constant 0 : index
    %c0_50 = arith.constant 0 : index
    %39 = vector.load %arg3[%c6_48, %c0_49, %c0_50] : memref<11x32x12xbf16, #tpu.memory_space<vmem>>, vector<1x32x12xbf16>
    %40 = vector.shape_cast %39 : vector<1x32x12xbf16> to vector<32x12xbf16>
    %cst_51 = arith.constant dense<0.000000e+00> : vector<32x128xf32>
    %41 = tpu.matmul %40, %38, %cst_51 {dimension_numbers = #tpu.dot_dimension_numbers<[1], [0], [0], [1], [0, 0, 1, 1], [], []>} : vector<32x12xbf16>, vector<12x128xbf16>, vector<32x128xf32> -> vector<32x128xf32>
    %42 = arith.addf %36, %41 : vector<32x128xf32>
    %c0_52 = arith.constant 0 : index
    %c0_53 = arith.constant 0 : index
    %c0_54 = arith.constant 0 : index
    %c7 = arith.constant 7 : index
    %43 = vector.load %arg2[%c0_52, %c0_53, %c0_54, %c7] : memref<1x1x12x138xbf16, #tpu.memory_space<vmem>>, vector<1x1x12x128xbf16>
    %44 = vector.shape_cast %43 : vector<1x1x12x128xbf16> to vector<12x128xbf16>
    %c7_55 = arith.constant 7 : index
    %c0_56 = arith.constant 0 : index
    %c0_57 = arith.constant 0 : index
    %45 = vector.load %arg3[%c7_55, %c0_56, %c0_57] : memref<11x32x12xbf16, #tpu.memory_space<vmem>>, vector<1x32x12xbf16>
    %46 = vector.shape_cast %45 : vector<1x32x12xbf16> to vector<32x12xbf16>
    %cst_58 = arith.constant dense<0.000000e+00> : vector<32x128xf32>
    %47 = tpu.matmul %46, %44, %cst_58 {dimension_numbers = #tpu.dot_dimension_numbers<[1], [0], [0], [1], [0, 0, 1, 1], [], []>} : vector<32x12xbf16>, vector<12x128xbf16>, vector<32x128xf32> -> vector<32x128xf32>
    %48 = arith.addf %42, %47 : vector<32x128xf32>
    %c0_59 = arith.constant 0 : index
    %c0_60 = arith.constant 0 : index
    %c0_61 = arith.constant 0 : index
    %c8 = arith.constant 8 : index
    %49 = vector.load %arg2[%c0_59, %c0_60, %c0_61, %c8] : memref<1x1x12x138xbf16, #tpu.memory_space<vmem>>, vector<1x1x12x128xbf16>
    %50 = vector.shape_cast %49 : vector<1x1x12x128xbf16> to vector<12x128xbf16>
    %c8_62 = arith.constant 8 : index
    %c0_63 = arith.constant 0 : index
    %c0_64 = arith.constant 0 : index
    %51 = vector.load %arg3[%c8_62, %c0_63, %c0_64] : memref<11x32x12xbf16, #tpu.memory_space<vmem>>, vector<1x32x12xbf16>
    %52 = vector.shape_cast %51 : vector<1x32x12xbf16> to vector<32x12xbf16>
    %cst_65 = arith.constant dense<0.000000e+00> : vector<32x128xf32>
    %53 = tpu.matmul %52, %50, %cst_65 {dimension_numbers = #tpu.dot_dimension_numbers<[1], [0], [0], [1], [0, 0, 1, 1], [], []>} : vector<32x12xbf16>, vector<12x128xbf16>, vector<32x128xf32> -> vector<32x128xf32>
    %54 = arith.addf %48, %53 : vector<32x128xf32>
    %c0_66 = arith.constant 0 : index
    %c0_67 = arith.constant 0 : index
    %c0_68 = arith.constant 0 : index
    %c9 = arith.constant 9 : index
    %55 = vector.load %arg2[%c0_66, %c0_67, %c0_68, %c9] : memref<1x1x12x138xbf16, #tpu.memory_space<vmem>>, vector<1x1x12x128xbf16>
    %56 = vector.shape_cast %55 : vector<1x1x12x128xbf16> to vector<12x128xbf16>
    %c9_69 = arith.constant 9 : index
    %c0_70 = arith.constant 0 : index
    %c0_71 = arith.constant 0 : index
    %57 = vector.load %arg3[%c9_69, %c0_70, %c0_71] : memref<11x32x12xbf16, #tpu.memory_space<vmem>>, vector<1x32x12xbf16>
    %58 = vector.shape_cast %57 : vector<1x32x12xbf16> to vector<32x12xbf16>
    %cst_72 = arith.constant dense<0.000000e+00> : vector<32x128xf32>
    %59 = tpu.matmul %58, %56, %cst_72 {dimension_numbers = #tpu.dot_dimension_numbers<[1], [0], [0], [1], [0, 0, 1, 1], [], []>} : vector<32x12xbf16>, vector<12x128xbf16>, vector<32x128xf32> -> vector<32x128xf32>
    %60 = arith.addf %54, %59 : vector<32x128xf32>
    %c0_73 = arith.constant 0 : index
    %c0_74 = arith.constant 0 : index
    %c0_75 = arith.constant 0 : index
    %c10 = arith.constant 10 : index
    %61 = vector.load %arg2[%c0_73, %c0_74, %c0_75, %c10] : memref<1x1x12x138xbf16, #tpu.memory_space<vmem>>, vector<1x1x12x128xbf16>
    %62 = vector.shape_cast %61 : vector<1x1x12x128xbf16> to vector<12x128xbf16>
    %c10_76 = arith.constant 10 : index
    %c0_77 = arith.constant 0 : index
    %c0_78 = arith.constant 0 : index
    %63 = vector.load %arg3[%c10_76, %c0_77, %c0_78] : memref<11x32x12xbf16, #tpu.memory_space<vmem>>, vector<1x32x12xbf16>
    %64 = vector.shape_cast %63 : vector<1x32x12xbf16> to vector<32x12xbf16>
    %cst_79 = arith.constant dense<0.000000e+00> : vector<32x128xf32>
    %65 = tpu.matmul %64, %62, %cst_79 {dimension_numbers = #tpu.dot_dimension_numbers<[1], [0], [0], [1], [0, 0, 1, 1], [], []>} : vector<32x12xbf16>, vector<12x128xbf16>, vector<32x128xf32> -> vector<32x128xf32>
    %66 = arith.addf %60, %65 : vector<32x128xf32>
    %67 = vector.broadcast %0 : vector<32x1xf32> to vector<32x128xf32>
    %68 = arith.mulf %66, %67 : vector<32x128xf32>
    %69 = vector.broadcast %1 : vector<32x1xf32> to vector<32x128xf32>
    %70 = arith.addf %68, %69 : vector<32x128xf32>
    %cst_80 = arith.constant 0.000000e+00 : f32
    %71 = vector.broadcast %cst_80 : f32 to vector<32x128xf32>
    %72 = arith.maximumf %70, %71 : vector<32x128xf32>
    %c0_81 = arith.constant 0 : index
    %c0_82 = arith.constant 0 : index
    %c0_83 = arith.constant 0 : index
    %73 = vector.load %arg6[%c0_81, %c0_82, %c0_83] : memref<1x32x128xf32, #tpu.memory_space<vmem>>, vector<1x32x128xf32>
    %74 = vector.shape_cast %73 : vector<1x32x128xf32> to vector<32x128xf32>
    %75 = vector.shape_cast %72 : vector<32x128xf32> to vector<1x32x128xf32>
    tpu.vector_store %arg6[%c0_81, %c0_82, %c0_83], %75 {strides = array<i32>} : memref<1x32x128xf32, #tpu.memory_space<vmem>>, vector<1x32x128xf32>,
    return
  }
  func.func @transform_0(%arg0: i32, %arg1: i32) -> (i32, i32, i32, i32) {
    %c0_i32 = arith.constant 0 : i32
    %c0_i32_0 = arith.constant 0 : i32
    %c0_i32_1 = arith.constant 0 : i32
    return %arg0, %arg1, %c0_i32, %c0_i32_0 : i32, i32, i32, i32
  }
  func.func @transform_1(%arg0: i32, %arg1: i32) -> (i32, i32, i32) {
    %c0_i32 = arith.constant 0 : i32
    %c0_i32_0 = arith.constant 0 : i32
    %c0_i32_1 = arith.constant 0 : i32
    %c0_i32_2 = arith.constant 0 : i32
    return %c0_i32, %c0_i32_0, %c0_i32_1 : i32, i32, i32
  }
  func.func @transform_2(%arg0: i32, %arg1: i32) -> (i32, i32) {
    %c0_i32 = arith.constant 0 : i32
    %c0_i32_0 = arith.constant 0 : i32
    %c0_i32_1 = arith.constant 0 : i32
    return %c0_i32, %c0_i32_0 : i32, i32
  }
  func.func @transform_3(%arg0: i32, %arg1: i32) -> (i32, i32) {
    %c0_i32 = arith.constant 0 : i32
    %c0_i32_0 = arith.constant 0 : i32
    %c0_i32_1 = arith.constant 0 : i32
    return %c0_i32, %c0_i32_0 : i32, i32
  }
  func.func @transform_4(%arg0: i32, %arg1: i32) -> (i32, i32, i32) {
    %c0_i32 = arith.constant 0 : i32
    %c0_i32_0 = arith.constant 0 : i32
    return %arg0, %c0_i32, %arg1 : i32, i32, i32
  }
}

</mosaic_0001>

<bundles_post_ra>
// kernel: dilated_stride_embed.2
= control target key start
LH: loop header
LB: loop body
LE: loop exit
PB: predicated region body
PF: predicated region fallthrough
CT: control target
= control target key end

     0   :  { %s1557_s9 = smov 0   ;;  %s1559_s10 = smov 0   ;;  %s1712_s0 = inlined_call_operand.vmem [shape: bf16[2,1,12,138], index: 0, kind: input, shape index: {}]   ;;  %s1713_s1 = inlined_call_operand.vmem [shape: bf16[11,32,12], index: 1, kind: input, shape index: {}]   ;;  %s1714_s2 = inlined_call_operand.vmem [shape: f32[2,1,32,2], index: 2, kind: output, shape index: {}]  }
   0x1   :  { %s1561_s11 = smov 0  }
   0x2 LB: > { %s24_s12 = sadd.s32 1, %s1526_s10  ;;  %p1242_p0 = scmp.ge.s32.totalorder %s1530_s11, 1  ;;  %s1530_s11 = sphi %s1561_s11, %s12_s11   ;;  %s1526_s10 = sphi %s1559_s10, %s1716_s10   ;;  %s1522_s9 = sphi %s1557_s9, %s1715_s9  }
   0x3   : > { %p26_p1 = scmp.ge.s32.totalorder %s24_s12, 2  ;;  %p132_p2 = scmp.lt.s32.totalorder %s1530_s11, 3 }
   0x5   : > { %s1718_s12 = smov (%p26_p1, %s24_s12), 0  ;;  %p133_p3 = pnand %p1242_p0, %p132_p2 }
   0x6   : > { %p162_p4 = scmp.lt.s32.totalorder (!%p133_p3), %s1522_s9, 1  ;;  %s1532_s21 = smov (!%p133_p3), 126  }
   0x7   : > { %136 = sbr.rel (%p133_p3) target bundleno = 532 (0x214), region = 28  ;;  %s1533_s22 = smov (!%p133_p3), 127  }
   0x8   : > { %s1534_s27 = smov (!%p133_p3), 125   ;;  %s1535_s28 = smov (!%p133_p3), 124  }
   0x9   : > { %s1536_s29 = smov (!%p133_p3), 123   ;;  %s1537_s30 = smov (!%p133_p3), 122  }
   0xa   : > { %s1538_s3 = smov (!%p133_p3), 121   ;;  %s1539_s4 = smov (!%p133_p3), 120  }
   0xb   : > { %s1540_s5 = smov (!%p133_p3), 119   ;;  %s1541_s6 = smov (!%p133_p3), 118  }
   0xc   : > { %s1720_s9 = smov (!%p162_p4, %s1522_s9), 1  ;;  %v1486_v0 = vld [vmem:[%s1713_s1 + $0x10] sm:$0xff]   ;;  %vm219_vm0 = vcmask 97280   ;;  %v1487_v1 = vld [vmem:[%s1713_s1] sm:$0xff]   ;;  %vm226_vm1 = vcmask 1045504   ;;  %v1489_v6 = vld [vmem:[%s1713_s1 + $0x8] sm:$0xff]  }
   0xd   : > { %s1336_s17 = sshll.u32 %s1720_s9, 4  ;;  %1373 = vmatprep.mubr.msk.bf16.mxu0 %vm219_vm0, %v1486_v0  ;;  %1379 = vmatprep.mubr.msk.bf16.mxu1 %vm219_vm0, %v1487_v1  ;;  %v1492_v7 = vld [vmem:[%s1713_s1 + $0x30] sm:$0xff]   ;;  %vm371_vm2 = vcmask 1031168   ;;  %vm217_vm3 = vcmask 1039360   ;;  %v1488_v15 = vld [vmem:[%s1713_s1 + $0x18] sm:$0xff]   ;;  %vm454_vm4 = vcmask 1022976  }
   0xe   : > { %s170_s20 = scalar_lea.vmem %s1712_s0, %s1336_s17  ;;  %v1490_v19 = vld [vmem:[%s1713_s1 + $0x20] sm:$0xff]   ;;  %vm537_vm5 = vcmask 1014784   ;;  %v1493_v22 = vld [vmem:[%s1713_s1 + $0x38] sm:$0xff]   ;;  %v1496_v23 = vld [vmem:[%s1713_s1 + $0x50] sm:$0xff]   ;;  %vm620_vm6 = vcmask 1006592   ;;  %vm703_vm7 = vcmask 998400  }
   0xf   : > { %v1482_v2 = vld [vmem:[%s170_s20] ss:$8 sps:$4 sm:$0x3f]   ;;  %v1484_v3 = vld [vmem:[%s170_s20 + $0x4] ss:$8 sps:$4 sm:$0x3f]  }
  0x10   : > { %367 = vrot.lane.b32.xlu1 %v1482_v2, %s1532_s21  ;;  %213 = vrot.lane.b32.xlu0 %v1482_v2, %s1533_s22  ;;  %v1485_v4 = vld [vmem:[%s170_s20] ss:$8 sps:$4 sm:$0x3f]   ;;  %v1497_v34 = vld [vmem:[%s1713_s1 + $0x58] sm:$0xff]   ;;  %vm786_vm8 = vcmask 990208   ;;  %vm869_vm9 = vcmask 982016  }
  0x11   : > { %1438 = vmatprep.subr.msk.bf16.mxu1 %vm226_vm1, %v1485_v4  ;;  %v301_v5 = vsel %vm226_vm1, %v1485_v4, 0  ;;  %v1491_v27 = vld [vmem:[%s1713_s1 + $0x28] sm:$0xff]   ;;  %v1494_v31 = vld [vmem:[%s1713_s1 + $0x40] sm:$0xff]   ;;  %v1500_v35 = vld [vmem:[%s1713_s1 + $0x70] sm:$0xff]   ;;  %vm952_vm10 = vcmask 973824   ;;  %vm1035_vm11 = vcmask 965632  }
  0x12   : > { %1378 = vmatpush3.bf16.msra.mxu1 %v301_v5  ;;  %v1495_v39 = vld [vmem:[%s1713_s1 + $0x48] sm:$0xff]   ;;  %v1498_v43 = vld [vmem:[%s1713_s1 + $0x60] sm:$0xff]   ;;  %v1501_v46 = vld [vmem:[%s1713_s1 + $0x78] sm:$0xff]   ;;  %s1337_s23 = sshll.u32 %s1720_s9, 5  ;;  %vm1136_vm13 = vcmask 7168   ;;  %vm1141_vm14 = vcmask 15360  }
  0x13   : > { %v1504_v47 = vld [vmem:[%s1713_s1 + $0x90] sm:$0xff]   ;;  %v1499_v51 = vld [vmem:[%s1713_s1 + $0x68] sm:$0xff]   ;;  %v1502_v55 = vld [vmem:[%s1713_s1 + $0x80] sm:$0xff]   ;;  %s179_s26 = scalar_lea.vmem %s1714_s2, %s1337_s23 }
  0x14   : > { %369 = vrot.lane.b32.xlu1 %v1484_v3, %s1532_s21  ;;  %215 = vrot.lane.b32.xlu0 %v1484_v3, %s1533_s22  ;;  %v1505_v58 = vld [vmem:[%s1713_s1 + $0x98] sm:$0xff]   ;;  %v1503_v62 = vld [vmem:[%s1713_s1 + $0x88] sm:$0xff]  }
  0x15   : > { %1380 = vmatmul.mubr.msk.bf16.vlgmr.msra.gmra.mxu1 %vm219_vm0, %v1489_v6  ;;  %v1506_v63 = vld [vmem:[%s1713_s1 + $0xa0] sm:$0xff]   ;;  %v1507_v1 = vld [vmem:[%s1713_s1 + $0xa8] sm:$0xff]  }
  0x16   : > { %1391 = vmatprep.mubr.msk.bf16.mxu1 %vm219_vm0, %v1492_v7 }
  0x18   : > { %452 = vrot.lane.b32.xlu1 %v1484_v3, %s1534_s27  ;;  %450 = vrot.lane.b32.xlu0 %v1482_v2, %s1534_s27 }
  0x1c   : > { %535 = vrot.lane.b32.xlu1 %v1484_v3, %s1535_s28  ;;  %533 = vrot.lane.b32.xlu0 %v1482_v2, %s1535_s28 }
  0x20   : > { %618 = vrot.lane.b32.xlu1 %v1484_v3, %s1536_s29  ;;  %616 = vrot.lane.b32.xlu0 %v1482_v2, %s1536_s29 }
  0x24   : > { %701 = vrot.lane.b32.xlu1 %v1484_v3, %s1537_s30  ;;  %699 = vrot.lane.b32.xlu0 %v1482_v2, %s1537_s30 }
  0x28   : > { %784 = vrot.lane.b32.xlu1 %v1484_v3, %s1538_s3  ;;  %782 = vrot.lane.b32.xlu0 %v1482_v2, %s1538_s3 }
  0x2c   : > { %867 = vrot.lane.b32.xlu1 %v1484_v3, %s1539_s4  ;;  %865 = vrot.lane.b32.xlu0 %v1482_v2, %s1539_s4 }
  0x30   : > { %950 = vrot.lane.b32.xlu1 %v1484_v3, %s1540_s5  ;;  %948 = vrot.lane.b32.xlu0 %v1482_v2, %s1540_s5 }
  0x34   : > { %1033 = vrot.lane.b32.xlu1 %v1484_v3, %s1541_s6  ;;  %1031 = vrot.lane.b32.xlu0 %v1482_v2, %s1541_s6 }
  0x82   : > { %v368_v8 = vpop.permute.xlu1 %367  ;;  %v214_v9 = vpop.permute.xlu0 %213 }
  0x86   : > { %v370_v10 = vpop.permute.xlu1 %369  ;;  %v216_v11 = vpop.permute.xlu0 %215 }
  0x87   : > { %v372_v12 = vsel %vm371_vm2, %v368_v8, %v370_v10  ;;  %v218_v13 = vsel %vm217_vm3, %v214_v9, %v216_v11 }
  0x88   : > { %1437 = vmatprep.subr.msk.bf16.mxu0 %vm226_vm1, %v218_v13  ;;  %v228_v14 = vsel %vm226_vm1, %v218_v13, 0  ;;  %v380_v16 = vsel %vm226_vm1, %v372_v12, 0 }
  0x89   : > { %1372 = vmatpush3.bf16.msra.mxu0 %v228_v14 }
  0x8a   : > { %1439 = vmatprep.subr.msk.bf16.mxu0 %vm226_vm1, %v372_v12  ;;  %v453_v17 = vpop.permute.xlu1 %452  ;;  %v451_v18 = vpop.permute.xlu0 %450 }
  0x8b   : > { %v455_v20 = vsel %vm454_vm4, %v451_v18, %v453_v17 }
  0x8c   : > { %1374 = vmatmul.mubr.msk.bf16.vlgmr.msra.gmra.mxu0 %vm219_vm0, %v1488_v15  ;;  %v463_v21 = vsel %vm226_vm1, %v455_v20, 0  ;;  %1440 = vmatprep.subr.msk.bf16.mxu1 %vm226_vm1, %v455_v20 }
  0x8d   : > { %1384 = vmatpush3.bf16.msra.mxu0 %v380_v16  ;;  %1390 = vmatpush3.bf16.msra.mxu1 %v463_v21 }
  0x8e   : > { %v536_v24 = vpop.permute.xlu1 %535  ;;  %v534_v25 = vpop.permute.xlu0 %533  ;;  %1385 = vmatprep.mubr.msk.bf16.mxu0 %vm219_vm0, %v1490_v19 }
  0x8f   : > { %v538_v26 = vsel %vm537_vm5, %v534_v25, %v536_v24 }
  0x90   : > { %1441 = vmatprep.subr.msk.bf16.mxu0 %vm226_vm1, %v538_v26  ;;  %1392 = vmatmul.mubr.msk.bf16.vlgmr.msra.gmra.mxu1 %vm219_vm0, %v1493_v22  ;;  %v546_v28 = vsel %vm226_vm1, %v538_v26, 0 }
  0x91   : > { %1403 = vmatprep.mubr.msk.bf16.mxu1 %vm219_vm0, %v1496_v23 }
  0x92   : > { %v619_v29 = vpop.permute.xlu1 %618  ;;  %v617_v30 = vpop.permute.xlu0 %616 }
  0x93   : > { %v621_v32 = vsel %vm620_vm6, %v617_v30, %v619_v29 }
  0x94   : > { %1386 = vmatmul.mubr.msk.bf16.vlgmr.msra.gmra.mxu0 %vm219_vm0, %v1491_v27  ;;  %v629_v33 = vsel %vm226_vm1, %v621_v32, 0  ;;  %1442 = vmatprep.subr.msk.bf16.mxu1 %vm226_vm1, %v621_v32 }
  0x95   : > { %1396 = vmatpush3.bf16.msra.mxu0 %v546_v28  ;;  %1402 = vmatpush3.bf16.msra.mxu1 %v629_v33 }
  0x96   : > { %v702_v36 = vpop.permute.xlu1 %701  ;;  %v700_v37 = vpop.permute.xlu0 %699  ;;  %1397 = vmatprep.mubr.msk.bf16.mxu0 %vm219_vm0, %v1494_v31 }
  0x97   : > { %v704_v38 = vsel %vm703_vm7, %v700_v37, %v702_v36 }
  0x98   : > { %1443 = vmatprep.subr.msk.bf16.mxu0 %vm226_vm1, %v704_v38  ;;  %1404 = vmatmul.mubr.msk.bf16.vlgmr.msra.gmra.mxu1 %vm219_vm0, %v1497_v34  ;;  %v712_v40 = vsel %vm226_vm1, %v704_v38, 0 }
  0x99   : > { %1415 = vmatprep.mubr.msk.bf16.mxu1 %vm219_vm0, %v1500_v35 }
  0x9a   : > { %v785_v41 = vpop.permute.xlu1 %784  ;;  %v783_v42 = vpop.permute.xlu0 %782 }
  0x9b   : > { %v787_v44 = vsel %vm786_vm8, %v783_v42, %v785_v41 }
  0x9c   : > { %1398 = vmatmul.mubr.msk.bf16.vlgmr.msra.gmra.mxu0 %vm219_vm0, %v1495_v39  ;;  %v795_v45 = vsel %vm226_vm1, %v787_v44, 0  ;;  %1444 = vmatprep.subr.msk.bf16.mxu1 %vm226_vm1, %v787_v44 }
  0x9d   : > { %1408 = vmatpush3.bf16.msra.mxu0 %v712_v40  ;;  %1414 = vmatpush3.bf16.msra.mxu1 %v795_v45 }
  0x9e   : > { %v868_v48 = vpop.permute.xlu1 %867  ;;  %v866_v49 = vpop.permute.xlu0 %865  ;;  %1409 = vmatprep.mubr.msk.bf16.mxu0 %vm219_vm0, %v1498_v43 }
  0x9f   : > { %v870_v50 = vsel %vm869_vm9, %v866_v49, %v868_v48 }
  0xa0   : > { %1445 = vmatprep.subr.msk.bf16.mxu0 %vm226_vm1, %v870_v50  ;;  %1416 = vmatmul.mubr.msk.bf16.vlgmr.msra.gmra.mxu1 %vm219_vm0, %v1501_v46  ;;  %v878_v52 = vsel %vm226_vm1, %v870_v50, 0 }
  0xa1   : > { %1427 = vmatprep.mubr.msk.bf16.mxu1 %vm219_vm0, %v1504_v47 }
  0xa2   : > { %v951_v53 = vpop.permute.xlu1 %950  ;;  %v949_v54 = vpop.permute.xlu0 %948 }
  0xa3   : > { %v953_v56 = vsel %vm952_vm10, %v949_v54, %v951_v53 }
  0xa4   : > { %1410 = vmatmul.mubr.msk.bf16.vlgmr.msra.gmra.mxu0 %vm219_vm0, %v1499_v51  ;;  %v961_v57 = vsel %vm226_vm1, %v953_v56, 0  ;;  %1446 = vmatprep.subr.msk.bf16.mxu1 %vm226_vm1, %v953_v56  ;;  %v1099_v56 = vlaneseq }
  0xa5   : > { %1420 = vmatpush3.bf16.msra.mxu0 %v878_v52  ;;  %1426 = vmatpush3.bf16.msra.mxu1 %v961_v57 }
  0xa6   : > { %v1034_v59 = vpop.permute.xlu1 %1033  ;;  %v1032_v60 = vpop.permute.xlu0 %1031  ;;  %1421 = vmatprep.mubr.msk.bf16.mxu0 %vm219_vm0, %v1502_v55 }
  0xa7   : > { %v1036_v61 = vsel %vm1035_vm11, %v1032_v60, %v1034_v59 }
  0xa8   : > { %1447 = vmatprep.subr.msk.bf16.mxu0 %vm226_vm1, %v1036_v61  ;;  %1428 = vmatmul.mubr.msk.bf16.vlgmr.msra.gmra.mxu1 %vm219_vm0, %v1505_v58  ;;  %v1044_v0 = vsel %vm226_vm1, %v1036_v61, 0 }
  0xac   : > { %1422 = vmatmul.mubr.msk.bf16.vlgmr.msra.gmra.mxu0 %vm219_vm0, %v1503_v62 }
  0xad   : > { %1432 = vmatpush3.bf16.msra.mxu0 %v1044_v0  ;;  %1433 = vmatprep.mubr.msk.bf16.mxu0 %vm219_vm0, %v1506_v63 }
  0xb4   : > { %1434 = vmatmul.mubr.msk.bf16.vlgmr.msra.gmra.mxu0 %vm219_vm0, %v1507_v1 }
  0xd5   : > { %v1381_v2 = vpop.f32.mrf.mxu1 }
  0xd7   : > { %v337_v3 = vpop.f32.mrf.mxu1 }
  0xd9   : > { %v1382_v4 = vpop.f32.mrf.mxu1 }
  0xdb   : > { %v340_v6 = vpop.f32.mrf.mxu1 }
 0x14c   : > { %v1375_v5 = vpop.f32.mrf.mxu0 }
 0x14d   : > { %v346_v20 = vadd.f32 %v1381_v2, %v1375_v5 }
 0x14e   : > { %v264_v7 = vpop.f32.mrf.mxu0 }
 0x14f   : > { %v338_v23 = vadd.f32 %v337_v3, %v264_v7  ;;  %v1100_v3 = vand.u32 127, %v1099_v56 }
 0x150   : > { %v1376_v8 = vpop.f32.mrf.mxu0  ;;  %v1393_v9 = vpop.f32.mrf.mxu1 }
 0x151   : > { %v349_v30 = vadd.f32 %v1382_v4, %v1376_v8  ;;  %vm1103_vm12 = vcmp.lt.s32.totalorder %v1100_v3, 16 }
 0x152   : > { %v267_v10 = vpop.f32.mrf.mxu0  ;;  %v499_v11 = vpop.f32.mrf.mxu1 }
 0x153   : > { %v341_v31 = vadd.f32 %v340_v6, %v267_v10 }
 0x154   : > { %v1387_v12 = vpop.f32.mrf.mxu0  ;;  %v1394_v13 = vpop.f32.mrf.mxu1 }
 0x155   : > { %v433_v24 = vadd.f32 %v1387_v12, %v346_v20 }
 0x156   : > { %v416_v14 = vpop.f32.mrf.mxu0  ;;  %v502_v15 = vpop.f32.mrf.mxu1 }
 0x157   : > { %v431_v27 = vadd.f32 %v416_v14, %v338_v23  ;;  %v516_v32 = vadd.f32 %v1393_v9, %v433_v24 }
 0x158   : > { %v1388_v16 = vpop.f32.mrf.mxu0  ;;  %v1405_v17 = vpop.f32.mrf.mxu1 }
 0x159   : > { %v514_v35 = vadd.f32 %v499_v11, %v431_v27  ;;  %v434_v36 = vadd.f32 %v1388_v16, %v349_v30 }
 0x15a   : > { %v419_v18 = vpop.f32.mrf.mxu0  ;;  %v665_v19 = vpop.f32.mrf.mxu1 }
 0x15b   : > { %v432_v37 = vadd.f32 %v419_v18, %v341_v31  ;;  %v517_v43 = vadd.f32 %v1394_v13, %v434_v36 }
 0x15c   : > { %v1399_v21 = vpop.f32.mrf.mxu0  ;;  %v1406_v22 = vpop.f32.mrf.mxu1 }
 0x15d   : > { %v599_v38 = vadd.f32 %v1399_v21, %v516_v32  ;;  %v515_v44 = vadd.f32 %v502_v15, %v432_v37 }
 0x15e   : > { %v582_v25 = vpop.f32.mrf.mxu0  ;;  %v668_v26 = vpop.f32.mrf.mxu1 }
 0x15f   : > { %v597_v41 = vadd.f32 %v582_v25, %v514_v35  ;;  %v682_v45 = vadd.f32 %v1405_v17, %v599_v38 }
 0x160   : > { %v1400_v28 = vpop.f32.mrf.mxu0  ;;  %v1417_v29 = vpop.f32.mrf.mxu1 }
 0x161   : > { %v680_v48 = vadd.f32 %v665_v19, %v597_v41  ;;  %v600_v49 = vadd.f32 %v1400_v28, %v517_v43 }
 0x162   : > { %v585_v33 = vpop.f32.mrf.mxu0  ;;  %v831_v34 = vpop.f32.mrf.mxu1 }
 0x163   : > { %v598_v50 = vadd.f32 %v585_v33, %v515_v44  ;;  %v683_v57 = vadd.f32 %v1406_v22, %v600_v49 }
 0x164   : > { %v1411_v39 = vpop.f32.mrf.mxu0  ;;  %v1418_v40 = vpop.f32.mrf.mxu1 }
 0x165   : > { %v765_v51 = vadd.f32 %v1411_v39, %v682_v45  ;;  %v681_v58 = vadd.f32 %v668_v26, %v598_v50 }
 0x166   : > { %v748_v42 = vpop.f32.mrf.mxu0  ;;  %v834_v47 = vpop.f32.mrf.mxu1 }
 0x167   : > { %v763_v53 = vadd.f32 %v748_v42, %v680_v48  ;;  %v848_v59 = vadd.f32 %v1417_v29, %v765_v51 }
 0x168   : > { %v1412_v46 = vpop.f32.mrf.mxu0  ;;  %v1429_v55 = vpop.f32.mrf.mxu1 }
 0x169   : > { %v846_v61 = vadd.f32 %v831_v34, %v763_v53  ;;  %v766_v62 = vadd.f32 %v1412_v46, %v683_v57 }
 0x16a   : > { %v751_v52 = vpop.f32.mrf.mxu0  ;;  %v997_v1 = vpop.f32.mrf.mxu1 }
 0x16b   : > { %v764_v63 = vadd.f32 %v751_v52, %v681_v58  ;;  %v849_v6 = vadd.f32 %v1418_v40, %v766_v62 }
 0x16c   : > { %v1423_v54 = vpop.f32.mrf.mxu0  ;;  %v1430_v9 = vpop.f32.mrf.mxu1 }
 0x16d   : > { %v931_v0 = vadd.f32 %v1423_v54, %v848_v59  ;;  %v847_v7 = vadd.f32 %v834_v47, %v764_v63 }
 0x16e   : > { %v914_v60 = vpop.f32.mrf.mxu0  ;;  %v1000_v18 = vpop.f32.mrf.mxu1 }
 0x16f   : > { %v929_v4 = vadd.f32 %v914_v60, %v846_v61  ;;  %v1014_v8 = vadd.f32 %v1429_v55, %v931_v0 }
 0x170   : > { %v1424_v2 = vpop.f32.mrf.mxu0 }
 0x171   : > { %v1012_v11 = vadd.f32 %v997_v1, %v929_v4  ;;  %v932_v12 = vadd.f32 %v1424_v2, %v849_v6 }
 0x172   : > { %v917_v5 = vpop.f32.mrf.mxu0 }
 0x173   : > { %v930_v13 = vadd.f32 %v917_v5, %v847_v7  ;;  %v1015_v20 = vadd.f32 %v1430_v9, %v932_v12 }
 0x174   : > { %v1435_v10 = vpop.f32.mrf.mxu0 }
 0x175   : > { %v1097_v14 = vadd.f32 %v1435_v10, %v1014_v8  ;;  %v1013_v21 = vadd.f32 %v1000_v18, %v930_v13 }
 0x176   : > { %v1080_v15 = vpop.f32.mrf.mxu0 }
 0x177   : > { %v1095_v16 = vadd.f32 %v1080_v15, %v1012_v11  ;;  %v1106_v17 = vsel %vm1103_vm12, %v1097_v14, 0.0 }
 0x178   : > { %v1436_v19 = vpop.f32.mrf.mxu0  ;;  %1112 = vadd.xlane.f32.xlu0 %v1106_v17  ;;  %v1122_v30 = vmul.f32 %v1106_v17, %v1106_v17 }
 0x179   : > { %v1104_v22 = vsel %vm1103_vm12, %v1095_v16, 0.0  ;;  %v1098_v25 = vadd.f32 %v1436_v19, %v1015_v20 }
 0x17a   : > { %v1083_v23 = vpop.f32.mrf.mxu0  ;;  %v1120_v24 = vmul.f32 %v1104_v22, %v1104_v22 }
 0x17b   : > { %v1096_v26 = vadd.f32 %v1083_v23, %v1013_v21  ;;  %v1107_v27 = vsel %vm1103_vm12, %v1098_v25, 0.0 }
 0x17c   : > { %1108 = vadd.xlane.f32.xlu0 %v1104_v22  ;;  %1124 = vadd.xlane.f32.xlu1 %v1120_v24  ;;  %v1123_v31 = vmul.f32 %v1107_v27, %v1107_v27 }
 0x17d   : > { %v1105_v28 = vsel %vm1103_vm12, %v1096_v26, 0.0 }
 0x17e   : > { %v1121_v29 = vmul.f32 %v1105_v28, %v1105_v28 }
 0x180   : > { %1114 = vadd.xlane.f32.xlu0 %v1107_v27  ;;  %1110 = vadd.xlane.f32.xlu1 %v1105_v28 }
 0x184   : > { %1126 = vadd.xlane.f32.xlu0 %v1121_v29  ;;  %1128 = vadd.xlane.f32.xlu1 %v1122_v30 }
 0x188   : > { %1130 = vadd.xlane.f32.xlu0 %v1123_v31 }
 0x201   : > { %v1113_v32 = vpop.xlane.xlu0 %1112 }
 0x205   : > { %v1109_v33 = vpop.xlane.xlu0 %1108  ;;  %v1125_v34 = vpop.xlane.xlu1 %1124 }
 0x206   : > { %v1137_v35 = vsel %vm1136_vm13, %v1109_v33, %v1125_v34 }
 0x207   : > { %1142 = vst.msk [vmem:[%s179_s26] sm:$0xff] %vm1141_vm14, %v1137_v35 }
 0x209   : > { %v1115_v36 = vpop.xlane.xlu0 %1114  ;;  %v1111_v37 = vpop.xlane.xlu1 %1110 }
 0x20d   : > { %v1127_v38 = vpop.xlane.xlu0 %1126  ;;  %v1129_v39 = vpop.xlane.xlu1 %1128 }
 0x20e   : > { %v1138_v40 = vsel %vm1136_vm13, %v1111_v37, %v1127_v38  ;;  %v1139_v41 = vsel %vm1136_vm13, %v1113_v32, %v1129_v39 }
 0x20f   : > { %1143 = vst.msk [vmem:[%s179_s26 + $0x8] sm:$0xff] %vm1141_vm14, %v1138_v40  ;;  %1144 = vst.msk [vmem:[%s179_s26 + $0x10] sm:$0xff] %vm1141_vm14, %v1139_v41 }
 0x211   : > { %v1131_v42 = vpop.xlane.xlu0 %1130 }
 0x212   : > { %v1140_v43 = vsel %vm1136_vm13, %v1115_v36, %v1131_v42 }
 0x213   : > { %1145 = vst.msk [vmem:[%s179_s26 + $0x18] sm:$0xff] %vm1141_vm14, %v1140_v43 }
 0x214 PF: > { %s12_s11 = sadd.s32 1, %s1530_s11   ;;  %s1715_s9 = smov %s1526_s10 }
 0x215   : > { %p9_p5 = scmp.ge.s32.totalorder %s12_s11, 4   ;;  %s1716_s10 = smov %s1718_s12 }
 0x217   :  { %11 = sbr.rel (!%p9_p5) target bundleno = 2 (0x2), region = 68 }

// kernel: dilated_stride_embed.3
= control target key start
LH: loop header
LB: loop body
LE: loop exit
PB: predicated region body
PF: predicated region fallthrough
CT: control target
= control target key end

     0   :  { %s1633_s15 = smov 0   ;;  %s1635_s16 = smov 0   ;;  %s1804_s0 = inlined_call_operand.vmem [shape: bf16[2,1,12,138], index: 0, kind: input, shape index: {}]   ;;  %s1805_s1 = inlined_call_operand.vmem [shape: bf16[11,32,12], index: 1, kind: input, shape index: {}]   ;;  %s1806_s2 = inlined_call_operand.vmem [shape: f32[32,1], index: 2, kind: input, shape index: {}]   ;;  %s1807_s3 = inlined_call_operand.vmem [shape: f32[32,1], index: 3, kind: input, shape index: {}]   ;;  %s1808_s4 = inlined_call_operand.vmem [shape: f32[2,32,128], index: 4, kind: output, shape index: {}]  }
   0x1   :  { %s1637_s17 = smov 0  }
   0x2 LB: > { %s26_s18 = sadd.s32 1, %s1591_s16  ;;  %p1304_p0 = scmp.ge.s32.totalorder %s1595_s17, 1  ;;  %s1595_s17 = sphi %s1637_s17, %s14_s17   ;;  %s1591_s16 = sphi %s1635_s16, %s1810_s16   ;;  %s1587_s15 = sphi %s1633_s15, %s1809_s15  }
   0x3   : > { %p28_p1 = scmp.ge.s32.totalorder %s26_s18, 2  ;;  %p182_p2 = scmp.lt.s32.totalorder %s1595_s17, 3 }
   0x5   : > { %s1812_s18 = smov (%p28_p1, %s26_s18), 0  ;;  %p183_p3 = pnand %p1304_p0, %p182_p2 }
   0x6   : > { %p215_p4 = scmp.lt.s32.totalorder (!%p183_p3), %s1587_s15, 1  ;;  %s1597_s27 = smov (!%p183_p3), 126  }
   0x7   : > { %186 = sbr.rel (%p183_p3) target bundleno = 388 (0x184), region = 36  ;;  %s1598_s28 = smov (!%p183_p3), 127  }
   0x8   : > { %s1599_s7 = smov (!%p183_p3), 125   ;;  %s1600_s8 = smov (!%p183_p3), 124  }
   0x9   : > { %s1601_s9 = smov (!%p183_p3), 123   ;;  %s1602_s10 = smov (!%p183_p3), 122  }
   0xa   : > { %s1603_s11 = smov (!%p183_p3), 121   ;;  %s1604_s12 = smov (!%p183_p3), 120  }
   0xb   : > { %s1605_s13 = smov (!%p183_p3), 119   ;;  %s1606_s14 = smov (!%p183_p3), 118  }
   0xc   : > { %s1814_s15 = smov (!%p215_p4, %s1587_s15), 1  ;;  %v1551_v0 = vld [vmem:[%s1805_s1 + $0x10] sm:$0xff]   ;;  %vm278_vm0 = vcmask 97280   ;;  %v1552_v1 = vld [vmem:[%s1805_s1] sm:$0xff]   ;;  %vm285_vm1 = vcmask 1045504   ;;  %v1554_v6 = vld [vmem:[%s1805_s1 + $0x8] sm:$0xff]  }
   0xd   : > { %s1398_s23 = sshll.u32 %s1814_s15, 4  ;;  %1435 = vmatprep.mubr.msk.bf16.mxu0 %vm278_vm0, %v1551_v0  ;;  %1441 = vmatprep.mubr.msk.bf16.mxu1 %vm278_vm0, %v1552_v1  ;;  %v1557_v7 = vld [vmem:[%s1805_s1 + $0x30] sm:$0xff]   ;;  %v1607_v8 = vmov 0   ;;  %v234_v9 = vld [vmem:[%s1806_s2 + $0x8] sm:$0xff]  ;;  %v233_v10 = vld [vmem:[%s1806_s2] sm:$0xff]  ;;  %vm430_vm2 = vcmask 1031168  }
   0xe   : > { %s223_s26 = scalar_lea.vmem %s1804_s0, %s1398_s23  ;;  %1546 = vset.pattern.permute.xlu1 %v1607_v8  ;;  %1545 = vset.pattern.permute.xlu0 %v1607_v8  ;;  %v235_v11 = vld [vmem:[%s1806_s2 + $0x10] sm:$0xff]  ;;  %v236_v12 = vld [vmem:[%s1806_s2 + $0x18] sm:$0xff]  ;;  %v237_v13 = vld [vmem:[%s1807_s3] sm:$0xff]  ;;  %vm276_vm3 = vcmask 1039360   ;;  %vm513_vm4 = vcmask 1022976   ;;  %vm596_vm5 = vcmask 1014784  }
   0xf   : > { %v1547_v2 = vld [vmem:[%s223_s26] ss:$8 sps:$4 sm:$0x3f]   ;;  %v1549_v3 = vld [vmem:[%s223_s26 + $0x4] ss:$8 sps:$4 sm:$0x3f]  }
  0x10   : > { %426 = vrot.lane.b32.xlu1 %v1547_v2, %s1597_s27  ;;  %272 = vrot.lane.b32.xlu0 %v1547_v2, %s1598_s28  ;;  %v1550_v4 = vld [vmem:[%s223_s26] ss:$8 sps:$4 sm:$0x3f]   ;;  %v239_v15 = vld [vmem:[%s1807_s3 + $0x10] sm:$0xff]  ;;  %vm679_vm6 = vcmask 1006592   ;;  %vm762_vm7 = vcmask 998400  }
  0x11   : > { %1500 = vmatprep.subr.msk.bf16.mxu1 %vm285_vm1, %v1550_v4  ;;  %v360_v5 = vsel %vm285_vm1, %v1550_v4, 0  ;;  %v238_v14 = vld [vmem:[%s1807_s3 + $0x8] sm:$0xff]  ;;  %v240_v16 = vld [vmem:[%s1807_s3 + $0x18] sm:$0xff]  ;;  %v1555_v28 = vld [vmem:[%s1805_s1 + $0x20] sm:$0xff]   ;;  %vm845_vm8 = vcmask 990208   ;;  %vm928_vm9 = vcmask 982016  }
  0x12   : > { %1440 = vmatpush3.bf16.msra.mxu1 %v360_v5  ;;  %v1553_v24 = vld [vmem:[%s1805_s1 + $0x18] sm:$0xff]   ;;  %v1561_v32 = vld [vmem:[%s1805_s1 + $0x50] sm:$0xff]   ;;  %v1556_v36 = vld [vmem:[%s1805_s1 + $0x28] sm:$0xff]   ;;  %vm1011_vm10 = vcmask 973824   ;;  %vm1094_vm11 = vcmask 965632  }
  0x13   : > { %v1558_v31 = vld [vmem:[%s1805_s1 + $0x38] sm:$0xff]   ;;  %v1559_v40 = vld [vmem:[%s1805_s1 + $0x40] sm:$0xff]   ;;  %v1565_v44 = vld [vmem:[%s1805_s1 + $0x70] sm:$0xff]  }
  0x14   : > { %428 = vrot.lane.b32.xlu1 %v1549_v3, %s1597_s27  ;;  %274 = vrot.lane.b32.xlu0 %v1549_v3, %s1598_s28  ;;  %v1562_v43 = vld [vmem:[%s1805_s1 + $0x58] sm:$0xff]   ;;  %v1560_v48 = vld [vmem:[%s1805_s1 + $0x48] sm:$0xff]   ;;  %s1399_s27 = sshll.u32 %s1814_s15, 5 }
  0x15   : > { %1442 = vmatmul.mubr.msk.bf16.vlgmr.msra.gmra.mxu1 %vm278_vm0, %v1554_v6  ;;  %v1563_v52 = vld [vmem:[%s1805_s1 + $0x60] sm:$0xff]   ;;  %v1566_v55 = vld [vmem:[%s1805_s1 + $0x78] sm:$0xff]   ;;  %v1569_v56 = vld [vmem:[%s1805_s1 + $0x90] sm:$0xff]   ;;  %s231_s30 = scalar_lea.vmem %s1808_s4, %s1399_s27 }
  0x16   : > { %1453 = vmatprep.mubr.msk.bf16.mxu1 %vm278_vm0, %v1557_v7  ;;  %v1564_v60 = vld [vmem:[%s1805_s1 + $0x68] sm:$0xff]   ;;  %v1567_v0 = vld [vmem:[%s1805_s1 + $0x80] sm:$0xff]  }
  0x17   : > { %v1568_v7 = vld [vmem:[%s1805_s1 + $0x88] sm:$0xff]   ;;  %v1571_v8 = vld [vmem:[%s1805_s1 + $0xa0] sm:$0xff]  }
  0x18   : > { %511 = vrot.lane.b32.xlu1 %v1549_v3, %s1599_s7  ;;  %509 = vrot.lane.b32.xlu0 %v1547_v2, %s1599_s7 }
  0x1c   : > { %594 = vrot.lane.b32.xlu1 %v1549_v3, %s1600_s8  ;;  %592 = vrot.lane.b32.xlu0 %v1547_v2, %s1600_s8 }
  0x20   : > { %677 = vrot.lane.b32.xlu1 %v1549_v3, %s1601_s9  ;;  %675 = vrot.lane.b32.xlu0 %v1547_v2, %s1601_s9 }
  0x24   : > { %760 = vrot.lane.b32.xlu1 %v1549_v3, %s1602_s10  ;;  %758 = vrot.lane.b32.xlu0 %v1547_v2, %s1602_s10 }
  0x28   : > { %843 = vrot.lane.b32.xlu1 %v1549_v3, %s1603_s11  ;;  %841 = vrot.lane.b32.xlu0 %v1547_v2, %s1603_s11 }
  0x2c   : > { %926 = vrot.lane.b32.xlu1 %v1549_v3, %s1604_s12  ;;  %924 = vrot.lane.b32.xlu0 %v1547_v2, %s1604_s12 }
  0x30   : > { %1009 = vrot.lane.b32.xlu1 %v1549_v3, %s1605_s13  ;;  %1007 = vrot.lane.b32.xlu0 %v1547_v2, %s1605_s13 }
  0x34   : > { %1092 = vrot.lane.b32.xlu1 %v1549_v3, %s1606_s14  ;;  %1090 = vrot.lane.b32.xlu0 %v1547_v2, %s1606_s14  ;;  %v1570_v3 = vld [vmem:[%s1805_s1 + $0x98] sm:$0xff]  }
  0x38   : > { %1165 = vperm.xlu1 %1546, %v234_v9   ;;  %1160 = vperm.xlu0 %1545, %v233_v10   ;;  %v1572_v10 = vld [vmem:[%s1805_s1 + $0xa8] sm:$0xff]  }
  0x3c   : > { %1170 = vperm.xlu1 %1546, %v235_v11   ;;  %1175 = vperm.xlu0 %1545, %v236_v12  }
  0x40   : > { %1184 = vperm.xlu1 %1546, %v237_v13   ;;  %1189 = vperm.xlu0 %1545, %v238_v14  }
  0x44   : > { %1194 = vperm.xlu1 %1546, %v239_v15   ;;  %1199 = vperm.xlu0 %1545, %v240_v16  }
  0x82   : > { %v427_v17 = vpop.permute.xlu1 %426  ;;  %v273_v18 = vpop.permute.xlu0 %272 }
  0x86   : > { %v429_v19 = vpop.permute.xlu1 %428  ;;  %v275_v20 = vpop.permute.xlu0 %274 }
  0x87   : > { %v431_v21 = vsel %vm430_vm2, %v427_v17, %v429_v19  ;;  %v277_v22 = vsel %vm276_vm3, %v273_v18, %v275_v20 }
  0x88   : > { %1499 = vmatprep.subr.msk.bf16.mxu0 %vm285_vm1, %v277_v22  ;;  %v287_v23 = vsel %vm285_vm1, %v277_v22, 0  ;;  %v439_v25 = vsel %vm285_vm1, %v431_v21, 0 }
  0x89   : > { %1434 = vmatpush3.bf16.msra.mxu0 %v287_v23 }
  0x8a   : > { %1501 = vmatprep.subr.msk.bf16.mxu0 %vm285_vm1, %v431_v21  ;;  %v512_v26 = vpop.permute.xlu1 %511  ;;  %v510_v27 = vpop.permute.xlu0 %509 }
  0x8b   : > { %v514_v29 = vsel %vm513_vm4, %v510_v27, %v512_v26 }
  0x8c   : > { %1436 = vmatmul.mubr.msk.bf16.vlgmr.msra.gmra.mxu0 %vm278_vm0, %v1553_v24  ;;  %v522_v30 = vsel %vm285_vm1, %v514_v29, 0  ;;  %1502 = vmatprep.subr.msk.bf16.mxu1 %vm285_vm1, %v514_v29 }
  0x8d   : > { %1446 = vmatpush3.bf16.msra.mxu0 %v439_v25  ;;  %1452 = vmatpush3.bf16.msra.mxu1 %v522_v30 }
  0x8e   : > { %v595_v33 = vpop.permute.xlu1 %594  ;;  %v593_v34 = vpop.permute.xlu0 %592  ;;  %1447 = vmatprep.mubr.msk.bf16.mxu0 %vm278_vm0, %v1555_v28 }
  0x8f   : > { %v597_v35 = vsel %vm596_vm5, %v593_v34, %v595_v33 }
  0x90   : > { %1503 = vmatprep.subr.msk.bf16.mxu0 %vm285_vm1, %v597_v35  ;;  %1454 = vmatmul.mubr.msk.bf16.vlgmr.msra.gmra.mxu1 %vm278_vm0, %v1558_v31  ;;  %v605_v37 = vsel %vm285_vm1, %v597_v35, 0 }
  0x91   : > { %1465 = vmatprep.mubr.msk.bf16.mxu1 %vm278_vm0, %v1561_v32 }
  0x92   : > { %v678_v38 = vpop.permute.xlu1 %677  ;;  %v676_v39 = vpop.permute.xlu0 %675 }
  0x93   : > { %v680_v41 = vsel %vm679_vm6, %v676_v39, %v678_v38 }
  0x94   : > { %1448 = vmatmul.mubr.msk.bf16.vlgmr.msra.gmra.mxu0 %vm278_vm0, %v1556_v36  ;;  %v688_v42 = vsel %vm285_vm1, %v680_v41, 0  ;;  %1504 = vmatprep.subr.msk.bf16.mxu1 %vm285_vm1, %v680_v41 }
  0x95   : > { %1458 = vmatpush3.bf16.msra.mxu0 %v605_v37  ;;  %1464 = vmatpush3.bf16.msra.mxu1 %v688_v42 }
  0x96   : > { %v761_v45 = vpop.permute.xlu1 %760  ;;  %v759_v46 = vpop.permute.xlu0 %758  ;;  %1459 = vmatprep.mubr.msk.bf16.mxu0 %vm278_vm0, %v1559_v40 }
  0x97   : > { %v763_v47 = vsel %vm762_vm7, %v759_v46, %v761_v45 }
  0x98   : > { %1505 = vmatprep.subr.msk.bf16.mxu0 %vm285_vm1, %v763_v47  ;;  %1466 = vmatmul.mubr.msk.bf16.vlgmr.msra.gmra.mxu1 %vm278_vm0, %v1562_v43  ;;  %v771_v49 = vsel %vm285_vm1, %v763_v47, 0 }
  0x99   : > { %1477 = vmatprep.mubr.msk.bf16.mxu1 %vm278_vm0, %v1565_v44 }
  0x9a   : > { %v844_v50 = vpop.permute.xlu1 %843  ;;  %v842_v51 = vpop.permute.xlu0 %841 }
  0x9b   : > { %v846_v53 = vsel %vm845_vm8, %v842_v51, %v844_v50 }
  0x9c   : > { %1460 = vmatmul.mubr.msk.bf16.vlgmr.msra.gmra.mxu0 %vm278_vm0, %v1560_v48  ;;  %v854_v54 = vsel %vm285_vm1, %v846_v53, 0  ;;  %1506 = vmatprep.subr.msk.bf16.mxu1 %vm285_vm1, %v846_v53 }
  0x9d   : > { %1470 = vmatpush3.bf16.msra.mxu0 %v771_v49  ;;  %1476 = vmatpush3.bf16.msra.mxu1 %v854_v54 }
  0x9e   : > { %v927_v57 = vpop.permute.xlu1 %926  ;;  %v925_v58 = vpop.permute.xlu0 %924  ;;  %1471 = vmatprep.mubr.msk.bf16.mxu0 %vm278_vm0, %v1563_v52 }
  0x9f   : > { %v929_v59 = vsel %vm928_vm9, %v925_v58, %v927_v57 }
  0xa0   : > { %1507 = vmatprep.subr.msk.bf16.mxu0 %vm285_vm1, %v929_v59  ;;  %1478 = vmatmul.mubr.msk.bf16.vlgmr.msra.gmra.mxu1 %vm278_vm0, %v1566_v55  ;;  %v937_v61 = vsel %vm285_vm1, %v929_v59, 0 }
  0xa1   : > { %1489 = vmatprep.mubr.msk.bf16.mxu1 %vm278_vm0, %v1569_v56 }
  0xa2   : > { %v1010_v62 = vpop.permute.xlu1 %1009  ;;  %v1008_v63 = vpop.permute.xlu0 %1007 }
  0xa3   : > { %v1012_v1 = vsel %vm1011_vm10, %v1008_v63, %v1010_v62 }
  0xa4   : > { %1472 = vmatmul.mubr.msk.bf16.vlgmr.msra.gmra.mxu0 %vm278_vm0, %v1564_v60  ;;  %v1020_v2 = vsel %vm285_vm1, %v1012_v1, 0  ;;  %1508 = vmatprep.subr.msk.bf16.mxu1 %vm285_vm1, %v1012_v1 }
  0xa5   : > { %1482 = vmatpush3.bf16.msra.mxu0 %v937_v61  ;;  %1488 = vmatpush3.bf16.msra.mxu1 %v1020_v2 }
  0xa6   : > { %v1093_v4 = vpop.permute.xlu1 %1092  ;;  %v1091_v5 = vpop.permute.xlu0 %1090  ;;  %1483 = vmatprep.mubr.msk.bf16.mxu0 %vm278_vm0, %v1567_v0 }
  0xa7   : > { %v1095_v6 = vsel %vm1094_vm11, %v1091_v5, %v1093_v4 }
  0xa8   : > { %1509 = vmatprep.subr.msk.bf16.mxu0 %vm285_vm1, %v1095_v6  ;;  %1490 = vmatmul.mubr.msk.bf16.vlgmr.msra.gmra.mxu1 %vm278_vm0, %v1570_v3  ;;  %v1103_v9 = vsel %vm285_vm1, %v1095_v6, 0 }
  0xac   : > { %1484 = vmatmul.mubr.msk.bf16.vlgmr.msra.gmra.mxu0 %vm278_vm0, %v1568_v7 }
  0xad   : > { %1494 = vmatpush3.bf16.msra.mxu0 %v1103_v9  ;;  %1495 = vmatprep.mubr.msk.bf16.mxu0 %vm278_vm0, %v1571_v8 }
  0xb3   : > { %v1166_v52 = vpop.permute.xlu1 %1165  ;;  %v1161_v62 = vpop.permute.xlu0 %1160 }
  0xb4   : > { %1496 = vmatmul.mubr.msk.bf16.vlgmr.msra.gmra.mxu0 %vm278_vm0, %v1572_v10 }
  0xb7   : > { %v1171_v2 = vpop.permute.xlu1 %1170 }
  0xd5   : > { %v1443_v11 = vpop.f32.mrf.mxu1 }
  0xd7   : > { %v396_v12 = vpop.f32.mrf.mxu1 }
  0xd9   : > { %v1444_v13 = vpop.f32.mrf.mxu1 }
  0xdb   : > { %v399_v15 = vpop.f32.mrf.mxu1 }
 0x14c   : > { %v1437_v14 = vpop.f32.mrf.mxu0 }
 0x14d   : > { %v405_v29 = vadd.f32 %v1443_v11, %v1437_v14  ;;  %v1176_v11 = vpop.permute.xlu0 %1175 }
 0x14e   : > { %v323_v16 = vpop.f32.mrf.mxu0 }
 0x14f   : > { %v397_v32 = vadd.f32 %v396_v12, %v323_v16 }
 0x150   : > { %v1438_v17 = vpop.f32.mrf.mxu0  ;;  %v1455_v18 = vpop.f32.mrf.mxu1 }
 0x151   : > { %v408_v36 = vadd.f32 %v1444_v13, %v1438_v17  ;;  %v1185_v17 = vpop.permute.xlu1 %1184 }
 0x152   : > { %v326_v19 = vpop.f32.mrf.mxu0  ;;  %v558_v20 = vpop.f32.mrf.mxu1 }
 0x153   : > { %v400_v40 = vadd.f32 %v399_v15, %v326_v19 }
 0x154   : > { %v1449_v21 = vpop.f32.mrf.mxu0  ;;  %v1456_v22 = vpop.f32.mrf.mxu1 }
 0x155   : > { %v492_v33 = vadd.f32 %v1449_v21, %v405_v29 }
 0x156   : > { %v475_v23 = vpop.f32.mrf.mxu0  ;;  %v561_v24 = vpop.f32.mrf.mxu1 }
 0x157   : > { %v490_v37 = vadd.f32 %v475_v23, %v397_v32  ;;  %v575_v41 = vadd.f32 %v1455_v18, %v492_v33 }
 0x158   : > { %v1450_v25 = vpop.f32.mrf.mxu0  ;;  %v1467_v26 = vpop.f32.mrf.mxu1 }
 0x159   : > { %v493_v42 = vadd.f32 %v1450_v25, %v408_v36  ;;  %v573_v45 = vadd.f32 %v558_v20, %v490_v37 }
 0x15a   : > { %v478_v27 = vpop.f32.mrf.mxu0  ;;  %v724_v28 = vpop.f32.mrf.mxu1 }
 0x15b   : > { %v491_v46 = vadd.f32 %v478_v27, %v400_v40  ;;  %v576_v50 = vadd.f32 %v1456_v22, %v493_v42  ;;  %v1190_v27 = vpop.permute.xlu0 %1189 }
 0x15c   : > { %v1461_v30 = vpop.f32.mrf.mxu0  ;;  %v1468_v31 = vpop.f32.mrf.mxu1 }
 0x15d   : > { %v658_v47 = vadd.f32 %v1461_v30, %v575_v41  ;;  %v574_v54 = vadd.f32 %v561_v24, %v491_v46  ;;  %v1195_v30 = vpop.permute.xlu1 %1194 }
 0x15e   : > { %v641_v34 = vpop.f32.mrf.mxu0  ;;  %v727_v35 = vpop.f32.mrf.mxu1 }
 0x15f   : > { %v656_v51 = vadd.f32 %v641_v34, %v573_v45  ;;  %v741_v55 = vadd.f32 %v1467_v26, %v658_v47 }
 0x160   : > { %v1462_v38 = vpop.f32.mrf.mxu0  ;;  %v1479_v39 = vpop.f32.mrf.mxu1 }
 0x161   : > { %v659_v56 = vadd.f32 %v1462_v38, %v576_v50  ;;  %v739_v59 = vadd.f32 %v724_v28, %v656_v51 }
 0x162   : > { %v644_v43 = vpop.f32.mrf.mxu0  ;;  %v890_v44 = vpop.f32.mrf.mxu1 }
 0x163   : > { %v657_v60 = vadd.f32 %v644_v43, %v574_v54  ;;  %v742_v0 = vadd.f32 %v1468_v31, %v659_v56 }
 0x164   : > { %v1473_v48 = vpop.f32.mrf.mxu0  ;;  %v1480_v49 = vpop.f32.mrf.mxu1 }
 0x165   : > { %v824_v61 = vadd.f32 %v1473_v48, %v741_v55  ;;  %v740_v5 = vadd.f32 %v727_v35, %v657_v60 }
 0x166   : > { %v807_v53 = vpop.f32.mrf.mxu0  ;;  %v893_v58 = vpop.f32.mrf.mxu1 }
 0x167   : > { %v822_v1 = vadd.f32 %v807_v53, %v739_v59  ;;  %v907_v6 = vadd.f32 %v1479_v39, %v824_v61 }
 0x168   : > { %v1474_v57 = vpop.f32.mrf.mxu0  ;;  %v1491_v4 = vpop.f32.mrf.mxu1 }
 0x169   : > { %v825_v7 = vadd.f32 %v1474_v57, %v742_v0  ;;  %v905_v9 = vadd.f32 %v890_v44, %v822_v1  ;;  %v1200_v44 = vpop.permute.xlu0 %1199 }
 0x16a   : > { %v810_v63 = vpop.f32.mrf.mxu0  ;;  %v1056_v13 = vpop.f32.mrf.mxu1 }
 0x16b   : > { %v823_v10 = vadd.f32 %v810_v63, %v740_v5  ;;  %v908_v15 = vadd.f32 %v1480_v49, %v825_v7 }
 0x16c   : > { %v1485_v3 = vpop.f32.mrf.mxu0  ;;  %v1492_v22 = vpop.f32.mrf.mxu1 }
 0x16d   : > { %v990_v12 = vadd.f32 %v1485_v3, %v907_v6  ;;  %v906_v19 = vadd.f32 %v893_v58, %v823_v10 }
 0x16e   : > { %v973_v8 = vpop.f32.mrf.mxu0  ;;  %v1059_v33 = vpop.f32.mrf.mxu1 }
 0x16f   : > { %v988_v16 = vadd.f32 %v973_v8, %v905_v9  ;;  %v1073_v20 = vadd.f32 %v1491_v4, %v990_v12 }
 0x170   : > { %v1486_v14 = vpop.f32.mrf.mxu0 }
 0x171   : > { %v991_v21 = vadd.f32 %v1486_v14, %v908_v15  ;;  %v1071_v24 = vadd.f32 %v1056_v13, %v988_v16 }
 0x172   : > { %v976_v18 = vpop.f32.mrf.mxu0 }
 0x173   : > { %v989_v25 = vadd.f32 %v976_v18, %v906_v19  ;;  %v1074_v29 = vadd.f32 %v1492_v22, %v991_v21 }
 0x174   : > { %v1497_v23 = vpop.f32.mrf.mxu0 }
 0x175   : > { %v1156_v26 = vadd.f32 %v1497_v23, %v1073_v20  ;;  %v1072_v35 = vadd.f32 %v1059_v33, %v989_v25 }
 0x176   : > { %v1139_v28 = vpop.f32.mrf.mxu0 }
 0x177   : > { %v1180_v31 = vmul.f32 %v1171_v2, %v1156_v26  ;;  %v1154_v32 = vadd.f32 %v1139_v28, %v1071_v24 }
 0x178   : > { %v1498_v34 = vpop.f32.mrf.mxu0 }
 0x179   : > { %v1204_v36 = vadd.f32 %v1195_v30, %v1180_v31  ;;  %v1178_v37 = vmul.f32 %v1161_v62, %v1154_v32  ;;  %v1157_v38 = vadd.f32 %v1498_v34, %v1074_v29 }
 0x17a   : > { %v1142_v39 = vpop.f32.mrf.mxu0 }
 0x17b   : > { %v1208_v40 = vmax.f32 %v1204_v36, 0.0  ;;  %v1202_v41 = vadd.f32 %v1185_v17, %v1178_v37  ;;  %v1181_v42 = vmul.f32 %v1176_v11, %v1157_v38  ;;  %v1155_v43 = vadd.f32 %v1142_v39, %v1072_v35 }
 0x17d   : > { %1212 = vst [vmem:[%s231_s30 + $0x10] sm:$0xff] %v1208_v40  ;;  %v1206_v45 = vmax.f32 %v1202_v41, 0.0  ;;  %v1205_v46 = vadd.f32 %v1200_v44, %v1181_v42  ;;  %v1179_v47 = vmul.f32 %v1166_v52, %v1155_v43 }
 0x17f   : > { %1210 = vst [vmem:[%s231_s30] sm:$0xff] %v1206_v45  ;;  %v1209_v48 = vmax.f32 %v1205_v46, 0.0  ;;  %v1203_v49 = vadd.f32 %v1190_v27, %v1179_v47 }
 0x181   : > { %1213 = vst [vmem:[%s231_s30 + $0x18] sm:$0xff] %v1209_v48  ;;  %v1207_v50 = vmax.f32 %v1203_v49, 0.0 }
 0x183   : > { %1211 = vst [vmem:[%s231_s30 + $0x8] sm:$0xff] %v1207_v50 }
 0x184 PF: > { %s14_s17 = sadd.s32 1, %s1595_s17   ;;  %s1809_s15 = smov %s1591_s16 }
 0x185   : > { %p11_p5 = scmp.ge.s32.totalorder %s14_s17, 4   ;;  %s1810_s16 = smov %s1812_s18 }
 0x187   :  { %13 = sbr.rel (!%p11_p5) target bundleno = 2 (0x2), region = 76 }

</bundles_post_ra>
